<compile_context>
chip_gen: v7x
topology: tpu7x:2x2x1
jax: 0.10.0
libtpu: 0.0.40
codegen_flags: <defaults>
</compile_context>

<pallas_src>
import functools

import jax
import jax.numpy as jnp
from jax import lax
from jax.experimental import pallas as pl
from jax.experimental.pallas import tpu as pltpu


_NCLS = 11
_NCLS_PAD = 128  # lane-dense padded logits width (sliced back to 11 outside the kernel)


# ----------------------------- fused Pallas kernel -----------------------------

def _fused_cnn_kernel(patches1_ref, w1_ref, b1_ref, w2_ref, b2_ref,
                      wf1_ref, bf1_ref, wf2_ref, bf2_ref,
                      out_ref,
                      z1_ref, a1_ref, pad1_ref, z2_ref, feat_ref,
                      *, P):
    """Whole SimpleCNN forward for one image (grid iterates over the batch)."""
    Q = P // 2            # spatial size after pool1
    Q2 = P // 4           # spatial size after pool2
    PAD = Q + 1           # zero rows above/below the flattened conv2 input
    C1, C2 = 32, 64

    # ---------- conv1 (1->32, 3x3, pad=1) + ReLU : one im2col matmul ----------
    y1 = jnp.dot(patches1_ref[...], w1_ref[...],
                 preferred_element_type=jnp.float32)                    # (P*P, 32) f32
    z1_ref[...] = jnp.maximum(y1 + b1_ref[...], 0.0)

    # ---------- pool1 (2x2, stride 2), writing into the zero-padded conv2 input ----------
    # z1 rows are flat h*P + w.  Even/odd strided loads pool along w ...
    a1_ref[...] = jnp.maximum(z1_ref[pl.ds(0, P * P // 2, 2), :],
                              z1_ref[pl.ds(1, P * P // 2, 2), :])       # rows = h*Q + w2
    # ... and consecutive Q-row blocks pool along h, landing directly in pad1's interior.
    pad1_ref[pl.ds(0, PAD), :] = jnp.zeros((PAD, C1), jnp.float32)
    pad1_ref[pl.ds(PAD + Q * Q, PAD), :] = jnp.zeros((PAD, C1), jnp.float32)
    for h2 in range(Q):
        top = a1_ref[pl.ds(P * h2, Q), :]          # h = 2*h2
        bot = a1_ref[pl.ds(P * h2 + Q, Q), :]      # h = 2*h2 + 1
        pad1_ref[pl.ds(PAD + h2 * Q, Q), :] = jnp.maximum(top, bot)

    # ---------- conv2 (32->64, 3x3, pad=1) + ReLU : in-kernel im2col via 9 shifted slices ----------
    # pad1 holds the pooled activation flattened as rows h*Q + w with Q+1 zero rows on each side.
    # Tap (dy,dx) is a row-shift by (dy-1)*Q + (dx-1); w-wraparound rows are masked to zero.
    w_idx = lax.broadcasted_iota(jnp.int32, (Q * Q, 1), 0) % Q          # w coordinate of each row
    acc2 = jnp.zeros((Q * Q, C2), jnp.float32)
    for dy in range(3):
        for dx in range(3):
            shift = (dy - 1) * Q + (dx - 1)
            tap = pad1_ref[pl.ds(PAD + shift, Q * Q), :]                # (Q*Q, 32) f32
            if dx == 0:
                tap = jnp.where(w_idx >= 1, tap, 0.0)                   # left edge reads padding
            elif dx == 2:
                tap = jnp.where(w_idx <= Q - 2, tap, 0.0)               # right edge reads padding
            acc2 = acc2 + jnp.dot(tap.astype(jnp.bfloat16), w2_ref[dy * 3 + dx],
                                  preferred_element_type=jnp.float32)
    z2_ref[...] = jnp.maximum(acc2 + b2_ref[...], 0.0)                  # (Q*Q, 64)

    # ---------- pool2 (2x2, stride 2) + flatten ----------
    # The flatten order here is (h2, w2, c); fc1's rows were permuted at init to match torch's
    # NCHW .view(), so no activation transpose is needed.
    for h2 in range(Q2):
        for w2 in range(Q2):
            r = (2 * h2) * Q + 2 * w2
            v = jnp.maximum(
                jnp.maximum(z2_ref[pl.ds(r, 1), :], z2_ref[pl.ds(r + 1, 1), :]),
                jnp.maximum(z2_ref[pl.ds(r + Q, 1), :], z2_ref[pl.ds(r + Q + 1, 1), :]))
            off = (h2 * Q2 + w2) * C2
            feat_ref[:, off:off + C2] = v                               # (1, 64) lane slice

    # ---------- fc1 + ReLU, fc2 (lane-dense 128-wide padded logits) ----------
    h = jnp.dot(feat_ref[...].astype(jnp.bfloat16), wf1_ref[...],
                preferred_element_type=jnp.float32) + bf1_ref[...]
    h = jnp.maximum(h, 0.0)                                             # (1, 256)
    logits = jnp.dot(h.astype(jnp.bfloat16), wf2_ref[...],
                     preferred_element_type=jnp.float32) + bf2_ref[...]  # (1, 128)
    out_ref[...] = logits.astype(out_ref.dtype)


# ----------------------------- wrapper / parameter layout -----------------------------

def init_params(num_pixels, key):
    """Deterministic synthetic parameters with the exact PyTorch SimpleCNN shapes."""
    ks = jax.random.split(key, 8)
    fc1_in = 64 * num_pixels * num_pixels // 16
    return {
        "conv1_w": 0.2 * jax.random.normal(ks[0], (32, 1, 3, 3), jnp.float32),
        "conv1_b": 0.1 * jax.random.normal(ks[1], (32,), jnp.float32),
        "conv2_w": 0.05 * jax.random.normal(ks[2], (64, 32, 3, 3), jnp.float32),
        "conv2_b": 0.1 * jax.random.normal(ks[3], (64,), jnp.float32),
        "fc1_w": 0.02 * jax.random.normal(ks[4], (256, fc1_in), jnp.float32),
        "fc1_b": 0.1 * jax.random.normal(ks[5], (256,), jnp.float32),
        "fc2_w": 0.05 * jax.random.normal(ks[6], (11, 256), jnp.float32),
        "fc2_b": 0.1 * jax.random.normal(ks[7], (11,), jnp.float32),
    }


def prepare_params(params, num_pixels):
    """One-time re-layout of the torch-style params into kernel-friendly (K, N) bf16 matrices."""
    Q2 = num_pixels // 4
    # conv weights -> (tap, Cin, Cout), tap = ky*3 + kx
    w1 = jnp.transpose(params["conv1_w"], (2, 3, 1, 0)).reshape(9, 32)
    w2 = jnp.transpose(params["conv2_w"], (2, 3, 1, 0)).reshape(9, 32, 64)
    # fc1: fold torch's NCHW flatten into the row ordering -> rows are (h2*Q2 + w2)*64 + c
    wf1 = params["fc1_w"].reshape(256, 64, Q2, Q2)
    wf1 = jnp.transpose(wf1, (2, 3, 1, 0)).reshape(64 * Q2 * Q2, 256)
    # fc2: transpose + zero-pad to 128 lanes for unmasked stores
    wf2 = jnp.pad(params["fc2_w"].T, ((0, 0), (0, _NCLS_PAD - _NCLS)))
    bf2 = jnp.pad(params["fc2_b"], (0, _NCLS_PAD - _NCLS))
    return {
        "w1": w1.astype(jnp.bfloat16),
        "b1": params["conv1_b"].reshape(1, 32).astype(jnp.float32),
        "w2": w2.astype(jnp.bfloat16),
        "b2": params["conv2_b"].reshape(1, 64).astype(jnp.float32),
        "wf1": wf1.astype(jnp.bfloat16),
        "bf1": params["fc1_b"].reshape(1, 256).astype(jnp.float32),
        "wf2": wf2.astype(jnp.bfloat16),
        "bf2": bf2.reshape(1, _NCLS_PAD).astype(jnp.float32),
    }


def _im2col_conv1(x_nchw, P):
    """conv1 im2col (Cin=1 so only a few KB) -> (B, P*P, 9), tap order ky*3 + kx."""
    B = x_nchw.shape[0]
    x = x_nchw.reshape(B, P, P)
    xp = jnp.pad(x, ((0, 0), (1, 1), (1, 1)))
    taps = [xp[:, dy:dy + P, dx:dx + P] for dy in range(3) for dx in range(3)]
    return jnp.stack(taps, axis=-1).reshape(B, P * P, 9)


def simple_cnn_forward(x_nchw, kp, num_pixels):
    """Fused Pallas forward. x_nchw: (B, 1, P, P) float32; kp: prepare_params() output."""
    P = num_pixels
    assert P % 4 == 0, "num_pixels must be divisible by 4 (two 2x2 pools)"
    B = x_nchw.shape[0]
    Q = P // 2
    fc1_in = 64 * P * P // 16

    patches1 = _im2col_conv1(x_nchw, P).astype(jnp.bfloat16)            # (B, P*P, 9)

    kernel = functools.partial(_fused_cnn_kernel, P=P)
    out = pl.pallas_call(
        kernel,
        out_shape=jax.ShapeDtypeStruct((B, 1, _NCLS_PAD), jnp.float32),
        grid_spec=pltpu.PrefetchScalarGridSpec(
            num_scalar_prefetch=0,
            grid=(B,),
            in_specs=[
                pl.BlockSpec((None, P * P, 9), lambda b: (b, 0, 0)),     # per-image patches
                pl.BlockSpec((9, 32), lambda b: (0, 0)),                  # conv1 weight (resident)
                pl.BlockSpec((1, 32), lambda b: (0, 0)),
                pl.BlockSpec((9, 32, 64), lambda b: (0, 0, 0)),           # conv2 weight (resident)
                pl.BlockSpec((1, 64), lambda b: (0, 0)),
                pl.BlockSpec((fc1_in, 256), lambda b: (0, 0)),            # fc1 weight (resident)
                pl.BlockSpec((1, 256), lambda b: (0, 0)),
                pl.BlockSpec((256, _NCLS_PAD), lambda b: (0, 0)),         # fc2 weight (resident)
                pl.BlockSpec((1, _NCLS_PAD), lambda b: (0, 0)),
            ],
            out_specs=pl.BlockSpec((None, 1, _NCLS_PAD), lambda b: (b, 0, 0)),
            scratch_shapes=[
                pltpu.VMEM((P * P, 32), jnp.float32),                     # conv1 output
                pltpu.VMEM((P * P // 2, 32), jnp.float32),                # pool1 w-stage
                pltpu.VMEM((Q * Q + 2 * (Q + 1), 32), jnp.float32),       # zero-padded conv2 input
                pltpu.VMEM((Q * Q, 64), jnp.float32),                     # conv2 output
                pltpu.VMEM((1, fc1_in), jnp.float32),                     # flattened features
            ],
        ),
        compiler_params=pltpu.CompilerParams(
            dimension_semantics=("parallel",),
            vmem_limit_bytes=32 * 1024 * 1024,
        ),
    )(patches1, kp["w1"], kp["b1"], kp["w2"], kp["b2"],
      kp["wf1"], kp["bf1"], kp["wf2"], kp["bf2"])

    return out.reshape(B, _NCLS_PAD)[:, :_NCLS]


# ----------------------------- pure-JAX f32 reference (PyTorch semantics) -----------------------------

def reference_forward(x_nchw, params, num_pixels):
    def conv(x, w, b):
        y = lax.conv_general_dilated(
            x, w, window_strides=(1, 1), padding=((1, 1), (1, 1)),
            dimension_numbers=("NCHW", "OIHW", "NCHW"))
        return y + b[None, :, None, None]

    def pool(x):
        return lax.reduce_window(x, -jnp.inf, lax.max,
                                 (1, 1, 2, 2), (1, 1, 2, 2), "VALID")

    y = pool(jnp.maximum(conv(x_nchw, params["conv1_w"], params["conv1_b"]), 0.0))
    y = pool(jnp.maximum(conv(y, params["conv2_w"], params["conv2_b"]), 0.0))
    y = y.reshape(y.shape[0], 64 * num_pixels * num_pixels // 16)
    y = jnp.maximum(y @ params["fc1_w"].T + params["fc1_b"], 0.0)
    y = y @ params["fc2_w"].T + params["fc2_b"]
    return y


# ----------------------------- main -----------------------------

if __name__ == "__main__":
    num_pixels = 16   # spatial size P (divisible by 4)
    batch = 2

    key = jax.random.PRNGKey(0)
    kx, kparam = jax.random.split(key)
    x = jax.random.normal(kx, (batch, 1, num_pixels, num_pixels), jnp.float32)
    params = init_params(num_pixels, kparam)
    kparams = prepare_params(params, num_pixels)   # one-time weight re-layout / bf16 cast

    fwd = jax.jit(functools.partial(simple_cnn_forward, num_pixels=num_pixels))
    out = jax.block_until_ready(fwd(x, kparams))

    assert out.shape == (batch, 11), out.shape
    assert out.dtype == jnp.float32

    ref = jax.block_until_ready(reference_forward(x, params, num_pixels))
    max_err = float(jnp.max(jnp.abs(out - ref)))
    # bf16 MXU inputs (f32 accumulation) -> compare against the f32 reference at 2e-2.
    assert jnp.allclose(out, ref, atol=2e-2, rtol=2e-2), max_err

    print("KERNEL_OK")
</pallas_src>

<mosaic_0001>
module attributes {stable_mosaic.version = 11 : i64} {
  func.func @_fused_cnn_kernel(%arg0: i32, %arg1: memref<1x256x9xbf16, #tpu.memory_space<vmem>>, %arg2: memref<9x32xbf16, #tpu.memory_space<vmem>>, %arg3: memref<1x32xf32, #tpu.memory_space<vmem>>, %arg4: memref<9x32x64xbf16, #tpu.memory_space<vmem>>, %arg5: memref<1x64xf32, #tpu.memory_space<vmem>>, %arg6: memref<1024x256xbf16, #tpu.memory_space<vmem>>, %arg7: memref<1x256xf32, #tpu.memory_space<vmem>>, %arg8: memref<256x128xbf16, #tpu.memory_space<vmem>>, %arg9: memref<1x128xf32, #tpu.memory_space<vmem>>, %arg10: memref<1x1x128xf32, #tpu.memory_space<vmem>>, %arg11: memref<256x32xf32, #tpu.memory_space<vmem>>, %arg12: memref<128x32xf32, #tpu.memory_space<vmem>>, %arg13: memref<82x32xf32, #tpu.memory_space<vmem>>, %arg14: memref<64x64xf32, #tpu.memory_space<vmem>>, %arg15: memref<1x1024xf32, #tpu.memory_space<vmem>>) attributes {dimension_semantics = [#tpu.dimension_semantics<parallel>], iteration_bounds = array<i64: 2>, scalar_prefetch = 0 : i64, scratch_operands = 5 : i64, tpu.core_type = #tpu.core_type<tc>, window_params = [{transform_indices = @transform_0, window_bounds = array<i64: 1, 256, 9>}, {pipeline_mode = #tpu.pipeline_mode<synchronous>, transform_indices = @transform_1, window_bounds = array<i64: 9, 32>}, {pipeline_mode = #tpu.pipeline_mode<synchronous>, transform_indices = @transform_2, window_bounds = array<i64: 1, 32>}, {pipeline_mode = #tpu.pipeline_mode<synchronous>, transform_indices = @transform_3, window_bounds = array<i64: 9, 32, 64>}, {pipeline_mode = #tpu.pipeline_mode<synchronous>, transform_indices = @transform_4, window_bounds = array<i64: 1, 64>}, {pipeline_mode = #tpu.pipeline_mode<synchronous>, transform_indices = @transform_5, window_bounds = array<i64: 1024, 256>}, {pipeline_mode = #tpu.pipeline_mode<synchronous>, transform_indices = @transform_6, window_bounds = array<i64: 1, 256>}, {pipeline_mode = #tpu.pipeline_mode<synchronous>, transform_indices = @transform_7, window_bounds = array<i64: 256, 128>}, {pipeline_mode = #tpu.pipeline_mode<synchronous>, transform_indices = @transform_8, window_bounds = array<i64: 1, 128>}, {transform_indices = @transform_9, window_bounds = array<i64: 1, 1, 128>}]} {
    %c0 = arith.constant 0 : index
    %c0_0 = arith.constant 0 : index
    %c0_1 = arith.constant 0 : index
    %0 = vector.load %arg1[%c0, %c0_0, %c0_1] : memref<1x256x9xbf16, #tpu.memory_space<vmem>>, vector<1x256x9xbf16>
    %1 = vector.shape_cast %0 : vector<1x256x9xbf16> to vector<256x9xbf16>
    %c0_2 = arith.constant 0 : index
    %c0_3 = arith.constant 0 : index
    %2 = vector.load %arg2[%c0_2, %c0_3] : memref<9x32xbf16, #tpu.memory_space<vmem>>, vector<9x32xbf16>
    %cst = arith.constant dense<0.000000e+00> : vector<256x32xf32>
    %3 = tpu.matmul %1, %2, %cst {dimension_numbers = #tpu.dot_dimension_numbers<[1], [0], [0], [1], [0, 0, 1, 1], [], []>} : vector<256x9xbf16>, vector<9x32xbf16>, vector<256x32xf32> -> vector<256x32xf32>
    %c0_4 = arith.constant 0 : index
    %c0_5 = arith.constant 0 : index
    %4 = vector.load %arg3[%c0_4, %c0_5] : memref<1x32xf32, #tpu.memory_space<vmem>>, vector<1x32xf32>
    %5 = vector.broadcast %4 : vector<1x32xf32> to vector<256x32xf32>
    %6 = arith.addf %3, %5 : vector<256x32xf32>
    %cst_6 = arith.constant 0.000000e+00 : f32
    %7 = vector.broadcast %cst_6 : f32 to vector<256x32xf32>
    %8 = arith.maximumf %6, %7 : vector<256x32xf32>
    %c0_7 = arith.constant 0 : index
    %c0_8 = arith.constant 0 : index
    %9 = vector.load %arg11[%c0_7, %c0_8] : memref<256x32xf32, #tpu.memory_space<vmem>>, vector<256x32xf32>
    tpu.vector_store %arg11[%c0_7, %c0_8], %8 {strides = array<i32>} : memref<256x32xf32, #tpu.memory_space<vmem>>, vector<256x32xf32>,
    %c0_9 = arith.constant 0 : index
    %c0_10 = arith.constant 0 : index
    %10 = tpu.strided_load %arg11[%c0_9, %c0_10] {strides = array<i32: 2, 1>} : memref<256x32xf32, #tpu.memory_space<vmem>>, vector<128x32xf32>
    %c1 = arith.constant 1 : index
    %c0_11 = arith.constant 0 : index
    %11 = tpu.strided_load %arg11[%c1, %c0_11] {strides = array<i32: 2, 1>} : memref<256x32xf32, #tpu.memory_space<vmem>>, vector<128x32xf32>
    %12 = arith.maximumf %10, %11 : vector<128x32xf32>
    %c0_12 = arith.constant 0 : index
    %c0_13 = arith.constant 0 : index
    %13 = vector.load %arg12[%c0_12, %c0_13] : memref<128x32xf32, #tpu.memory_space<vmem>>, vector<128x32xf32>
    tpu.vector_store %arg12[%c0_12, %c0_13], %12 {strides = array<i32>} : memref<128x32xf32, #tpu.memory_space<vmem>>, vector<128x32xf32>,
    %cst_14 = arith.constant 0.000000e+00 : f32
    %14 = vector.broadcast %cst_14 : f32 to vector<9x32xf32>
    %c0_15 = arith.constant 0 : index
    %c0_16 = arith.constant 0 : index
    %15 = vector.load %arg13[%c0_15, %c0_16] : memref<82x32xf32, #tpu.memory_space<vmem>>, vector<9x32xf32>
    tpu.vector_store %arg13[%c0_15, %c0_16], %14 {strides = array<i32>} : memref<82x32xf32, #tpu.memory_space<vmem>>, vector<9x32xf32>,
    %cst_17 = arith.constant 0.000000e+00 : f32
    %16 = vector.broadcast %cst_17 : f32 to vector<9x32xf32>
    %c73 = arith.constant 73 : index
    %c0_18 = arith.constant 0 : index
    %17 = vector.load %arg13[%c73, %c0_18] : memref<82x32xf32, #tpu.memory_space<vmem>>, vector<9x32xf32>
    tpu.vector_store %arg13[%c73, %c0_18], %16 {strides = array<i32>} : memref<82x32xf32, #tpu.memory_space<vmem>>, vector<9x32xf32>,
    %c0_19 = arith.constant 0 : index
    %c0_20 = arith.constant 0 : index
    %18 = vector.load %arg12[%c0_19, %c0_20] : memref<128x32xf32, #tpu.memory_space<vmem>>, vector<8x32xf32>
    %c8 = arith.constant 8 : index
    %c0_21 = arith.constant 0 : index
    %19 = vector.load %arg12[%c8, %c0_21] : memref<128x32xf32, #tpu.memory_space<vmem>>, vector<8x32xf32>
    %20 = arith.maximumf %18, %19 : vector<8x32xf32>
    %c9 = arith.constant 9 : index
    %c0_22 = arith.constant 0 : index
    %21 = vector.load %arg13[%c9, %c0_22] : memref<82x32xf32, #tpu.memory_space<vmem>>, vector<8x32xf32>
    tpu.vector_store %arg13[%c9, %c0_22], %20 {strides = array<i32>} : memref<82x32xf32, #tpu.memory_space<vmem>>, vector<8x32xf32>,
    %c16 = arith.constant 16 : index
    %c0_23 = arith.constant 0 : index
    %22 = vector.load %arg12[%c16, %c0_23] : memref<128x32xf32, #tpu.memory_space<vmem>>, vector<8x32xf32>
    %c24 = arith.constant 24 : index
    %c0_24 = arith.constant 0 : index
    %23 = vector.load %arg12[%c24, %c0_24] : memref<128x32xf32, #tpu.memory_space<vmem>>, vector<8x32xf32>
    %24 = arith.maximumf %22, %23 : vector<8x32xf32>
    %c17 = arith.constant 17 : index
    %c0_25 = arith.constant 0 : index
    %25 = vector.load %arg13[%c17, %c0_25] : memref<82x32xf32, #tpu.memory_space<vmem>>, vector<8x32xf32>
    tpu.vector_store %arg13[%c17, %c0_25], %24 {strides = array<i32>} : memref<82x32xf32, #tpu.memory_space<vmem>>, vector<8x32xf32>,
    %c32 = arith.constant 32 : index
    %c0_26 = arith.constant 0 : index
    %26 = vector.load %arg12[%c32, %c0_26] : memref<128x32xf32, #tpu.memory_space<vmem>>, vector<8x32xf32>
    %c40 = arith.constant 40 : index
    %c0_27 = arith.constant 0 : index
    %27 = vector.load %arg12[%c40, %c0_27] : memref<128x32xf32, #tpu.memory_space<vmem>>, vector<8x32xf32>
    %28 = arith.maximumf %26, %27 : vector<8x32xf32>
    %c25 = arith.constant 25 : index
    %c0_28 = arith.constant 0 : index
    %29 = vector.load %arg13[%c25, %c0_28] : memref<82x32xf32, #tpu.memory_space<vmem>>, vector<8x32xf32>
    tpu.vector_store %arg13[%c25, %c0_28], %28 {strides = array<i32>} : memref<82x32xf32, #tpu.memory_space<vmem>>, vector<8x32xf32>,
    %c48 = arith.constant 48 : index
    %c0_29 = arith.constant 0 : index
    %30 = vector.load %arg12[%c48, %c0_29] : memref<128x32xf32, #tpu.memory_space<vmem>>, vector<8x32xf32>
    %c56 = arith.constant 56 : index
    %c0_30 = arith.constant 0 : index
    %31 = vector.load %arg12[%c56, %c0_30] : memref<128x32xf32, #tpu.memory_space<vmem>>, vector<8x32xf32>
    %32 = arith.maximumf %30, %31 : vector<8x32xf32>
    %c33 = arith.constant 33 : index
    %c0_31 = arith.constant 0 : index
    %33 = vector.load %arg13[%c33, %c0_31] : memref<82x32xf32, #tpu.memory_space<vmem>>, vector<8x32xf32>
    tpu.vector_store %arg13[%c33, %c0_31], %32 {strides = array<i32>} : memref<82x32xf32, #tpu.memory_space<vmem>>, vector<8x32xf32>,
    %c64 = arith.constant 64 : index
    %c0_32 = arith.constant 0 : index
    %34 = vector.load %arg12[%c64, %c0_32] : memref<128x32xf32, #tpu.memory_space<vmem>>, vector<8x32xf32>
    %c72 = arith.constant 72 : index
    %c0_33 = arith.constant 0 : index
    %35 = vector.load %arg12[%c72, %c0_33] : memref<128x32xf32, #tpu.memory_space<vmem>>, vector<8x32xf32>
    %36 = arith.maximumf %34, %35 : vector<8x32xf32>
    %c41 = arith.constant 41 : index
    %c0_34 = arith.constant 0 : index
    %37 = vector.load %arg13[%c41, %c0_34] : memref<82x32xf32, #tpu.memory_space<vmem>>, vector<8x32xf32>
    tpu.vector_store %arg13[%c41, %c0_34], %36 {strides = array<i32>} : memref<82x32xf32, #tpu.memory_space<vmem>>, vector<8x32xf32>,
    %c80 = arith.constant 80 : index
    %c0_35 = arith.constant 0 : index
    %38 = vector.load %arg12[%c80, %c0_35] : memref<128x32xf32, #tpu.memory_space<vmem>>, vector<8x32xf32>
    %c88 = arith.constant 88 : index
    %c0_36 = arith.constant 0 : index
    %39 = vector.load %arg12[%c88, %c0_36] : memref<128x32xf32, #tpu.memory_space<vmem>>, vector<8x32xf32>
    %40 = arith.maximumf %38, %39 : vector<8x32xf32>
    %c49 = arith.constant 49 : index
    %c0_37 = arith.constant 0 : index
    %41 = vector.load %arg13[%c49, %c0_37] : memref<82x32xf32, #tpu.memory_space<vmem>>, vector<8x32xf32>
    tpu.vector_store %arg13[%c49, %c0_37], %40 {strides = array<i32>} : memref<82x32xf32, #tpu.memory_space<vmem>>, vector<8x32xf32>,
    %c96 = arith.constant 96 : index
    %c0_38 = arith.constant 0 : index
    %42 = vector.load %arg12[%c96, %c0_38] : memref<128x32xf32, #tpu.memory_space<vmem>>, vector<8x32xf32>
    %c104 = arith.constant 104 : index
    %c0_39 = arith.constant 0 : index
    %43 = vector.load %arg12[%c104, %c0_39] : memref<128x32xf32, #tpu.memory_space<vmem>>, vector<8x32xf32>
    %44 = arith.maximumf %42, %43 : vector<8x32xf32>
    %c57 = arith.constant 57 : index
    %c0_40 = arith.constant 0 : index
    %45 = vector.load %arg13[%c57, %c0_40] : memref<82x32xf32, #tpu.memory_space<vmem>>, vector<8x32xf32>
    tpu.vector_store %arg13[%c57, %c0_40], %44 {strides = array<i32>} : memref<82x32xf32, #tpu.memory_space<vmem>>, vector<8x32xf32>,
    %c112 = arith.constant 112 : index
    %c0_41 = arith.constant 0 : index
    %46 = vector.load %arg12[%c112, %c0_41] : memref<128x32xf32, #tpu.memory_space<vmem>>, vector<8x32xf32>
    %c120 = arith.constant 120 : index
    %c0_42 = arith.constant 0 : index
    %47 = vector.load %arg12[%c120, %c0_42] : memref<128x32xf32, #tpu.memory_space<vmem>>, vector<8x32xf32>
    %48 = arith.maximumf %46, %47 : vector<8x32xf32>
    %c65 = arith.constant 65 : index
    %c0_43 = arith.constant 0 : index
    %49 = vector.load %arg13[%c65, %c0_43] : memref<82x32xf32, #tpu.memory_space<vmem>>, vector<8x32xf32>
    tpu.vector_store %arg13[%c65, %c0_43], %48 {strides = array<i32>} : memref<82x32xf32, #tpu.memory_space<vmem>>, vector<8x32xf32>,
    %50 = tpu.iota {dimensions = array<i32: 0>} : vector<64x1xi32>
    %c8_i32 = arith.constant 8 : i32
    %c0_i32 = arith.constant 0 : i32
    %51 = arith.cmpi eq, %c8_i32, %c0_i32 : i32
    %c1_i32 = arith.constant 1 : i32
    %52 = arith.select %51, %c1_i32, %c8_i32 : i32
    %53 = vector.broadcast %52 : i32 to vector<64x1xi32>
    %54 = arith.remsi %50, %53 : vector<64x1xi32>
    %c0_i32_44 = arith.constant 0 : i32
    %55 = vector.broadcast %c0_i32_44 : i32 to vector<64x1xi32>
    %56 = arith.cmpi ne, %54, %55 : vector<64x1xi32>
    %c0_i32_45 = arith.constant 0 : i32
    %57 = vector.broadcast %c0_i32_45 : i32 to vector<64x1xi32>
    %58 = arith.cmpi slt, %54, %57 : vector<64x1xi32>
    %c0_i32_46 = arith.constant 0 : i32
    %59 = arith.cmpi slt, %52, %c0_i32_46 : i32
    %60 = vector.broadcast %59 : i1 to vector<64x1xi1>
    %61 = vector.broadcast %60 : vector<64x1xi1> to vector<64x1xi1>
    %62 = arith.xori %58, %61 : vector<64x1xi1>
    %63 = arith.andi %62, %56 : vector<64x1xi1>
    %64 = vector.broadcast %52 : i32 to vector<64x1xi32>
    %65 = arith.addi %54, %64 : vector<64x1xi32>
    %66 = arith.select %63, %65, %54 : vector<64x1xi1>, vector<64x1xi32>
    %cst_47 = arith.constant 0.000000e+00 : f32
    %67 = vector.broadcast %cst_47 : f32 to vector<64x64xf32>
    %c0_48 = arith.constant 0 : index
    %c0_49 = arith.constant 0 : index
    %68 = vector.load %arg13[%c0_48, %c0_49] : memref<82x32xf32, #tpu.memory_space<vmem>>, vector<64x32xf32>
    %c1_i32_50 = arith.constant 1 : i32
    %69 = vector.broadcast %c1_i32_50 : i32 to vector<64x1xi32>
    %70 = arith.cmpi sge, %66, %69 : vector<64x1xi32>
    %cst_51 = arith.constant 0.000000e+00 : f32
    %71 = vector.shape_cast %70 : vector<64x1xi1> to vector<64x1xi1>
    %72 = vector.broadcast %71 : vector<64x1xi1> to vector<64x32xi1>
    %73 = vector.broadcast %cst_51 : f32 to vector<64x32xf32>
    %74 = arith.select %72, %68, %73 : vector<64x32xi1>, vector<64x32xf32>
    %75 = arith.truncf %74 : vector<64x32xf32> to vector<64x32xbf16>
    %c0_52 = arith.constant 0 : index
    %c0_53 = arith.constant 0 : index
    %c0_54 = arith.constant 0 : index
    %76 = vector.load %arg4[%c0_52, %c0_53, %c0_54] : memref<9x32x64xbf16, #tpu.memory_space<vmem>>, vector<1x32x64xbf16>
    %77 = vector.shape_cast %76 : vector<1x32x64xbf16> to vector<32x64xbf16>
    %cst_55 = arith.constant dense<0.000000e+00> : vector<64x64xf32>
    %78 = tpu.matmul %75, %77, %cst_55 {dimension_numbers = #tpu.dot_dimension_numbers<[1], [0], [0], [1], [0, 0, 1, 1], [], []>} : vector<64x32xbf16>, vector<32x64xbf16>, vector<64x64xf32> -> vector<64x64xf32>
    %79 = arith.addf %67, %78 : vector<64x64xf32>
    %c1_56 = arith.constant 1 : index
    %c0_57 = arith.constant 0 : index
    %80 = vector.load %arg13[%c1_56, %c0_57] : memref<82x32xf32, #tpu.memory_space<vmem>>, vector<64x32xf32>
    %81 = arith.truncf %80 : vector<64x32xf32> to vector<64x32xbf16>
    %c1_58 = arith.constant 1 : index
    %c0_59 = arith.constant 0 : index
    %c0_60 = arith.constant 0 : index
    %82 = vector.load %arg4[%c1_58, %c0_59, %c0_60] : memref<9x32x64xbf16, #tpu.memory_space<vmem>>, vector<1x32x64xbf16>
    %83 = vector.shape_cast %82 : vector<1x32x64xbf16> to vector<32x64xbf16>
    %cst_61 = arith.constant dense<0.000000e+00> : vector<64x64xf32>
    %84 = tpu.matmul %81, %83, %cst_61 {dimension_numbers = #tpu.dot_dimension_numbers<[1], [0], [0], [1], [0, 0, 1, 1], [], []>} : vector<64x32xbf16>, vector<32x64xbf16>, vector<64x64xf32> -> vector<64x64xf32>
    %85 = arith.addf %79, %84 : vector<64x64xf32>
    %c2 = arith.constant 2 : index
    %c0_62 = arith.constant 0 : index
    %86 = vector.load %arg13[%c2, %c0_62] : memref<82x32xf32, #tpu.memory_space<vmem>>, vector<64x32xf32>
    %c6_i32 = arith.constant 6 : i32
    %87 = vector.broadcast %c6_i32 : i32 to vector<64x1xi32>
    %88 = arith.cmpi sle, %66, %87 : vector<64x1xi32>
    %cst_63 = arith.constant 0.000000e+00 : f32
    %89 = vector.shape_cast %88 : vector<64x1xi1> to vector<64x1xi1>
    %90 = vector.broadcast %89 : vector<64x1xi1> to vector<64x32xi1>
    %91 = vector.broadcast %cst_63 : f32 to vector<64x32xf32>
    %92 = arith.select %90, %86, %91 : vector<64x32xi1>, vector<64x32xf32>
    %93 = arith.truncf %92 : vector<64x32xf32> to vector<64x32xbf16>
    %c2_64 = arith.constant 2 : index
    %c0_65 = arith.constant 0 : index
    %c0_66 = arith.constant 0 : index
    %94 = vector.load %arg4[%c2_64, %c0_65, %c0_66] : memref<9x32x64xbf16, #tpu.memory_space<vmem>>, vector<1x32x64xbf16>
    %95 = vector.shape_cast %94 : vector<1x32x64xbf16> to vector<32x64xbf16>
    %cst_67 = arith.constant dense<0.000000e+00> : vector<64x64xf32>
    %96 = tpu.matmul %93, %95, %cst_67 {dimension_numbers = #tpu.dot_dimension_numbers<[1], [0], [0], [1], [0, 0, 1, 1], [], []>} : vector<64x32xbf16>, vector<32x64xbf16>, vector<64x64xf32> -> vector<64x64xf32>
    %97 = arith.addf %85, %96 : vector<64x64xf32>
    %c8_68 = arith.constant 8 : index
    %c0_69 = arith.constant 0 : index
    %98 = vector.load %arg13[%c8_68, %c0_69] : memref<82x32xf32, #tpu.memory_space<vmem>>, vector<64x32xf32>
    %c1_i32_70 = arith.constant 1 : i32
    %99 = vector.broadcast %c1_i32_70 : i32 to vector<64x1xi32>
    %100 = arith.cmpi sge, %66, %99 : vector<64x1xi32>
    %cst_71 = arith.constant 0.000000e+00 : f32
    %101 = vector.shape_cast %100 : vector<64x1xi1> to vector<64x1xi1>
    %102 = vector.broadcast %101 : vector<64x1xi1> to vector<64x32xi1>
    %103 = vector.broadcast %cst_71 : f32 to vector<64x32xf32>
    %104 = arith.select %102, %98, %103 : vector<64x32xi1>, vector<64x32xf32>
    %105 = arith.truncf %104 : vector<64x32xf32> to vector<64x32xbf16>
    %c3 = arith.constant 3 : index
    %c0_72 = arith.constant 0 : index
    %c0_73 = arith.constant 0 : index
    %106 = vector.load %arg4[%c3, %c0_72, %c0_73] : memref<9x32x64xbf16, #tpu.memory_space<vmem>>, vector<1x32x64xbf16>
    %107 = vector.shape_cast %106 : vector<1x32x64xbf16> to vector<32x64xbf16>
    %cst_74 = arith.constant dense<0.000000e+00> : vector<64x64xf32>
    %108 = tpu.matmul %105, %107, %cst_74 {dimension_numbers = #tpu.dot_dimension_numbers<[1], [0], [0], [1], [0, 0, 1, 1], [], []>} : vector<64x32xbf16>, vector<32x64xbf16>, vector<64x64xf32> -> vector<64x64xf32>
    %109 = arith.addf %97, %108 : vector<64x64xf32>
    %c9_75 = arith.constant 9 : index
    %c0_76 = arith.constant 0 : index
    %110 = vector.load %arg13[%c9_75, %c0_76] : memref<82x32xf32, #tpu.memory_space<vmem>>, vector<64x32xf32>
    %111 = arith.truncf %110 : vector<64x32xf32> to vector<64x32xbf16>
    %c4 = arith.constant 4 : index
    %c0_77 = arith.constant 0 : index
    %c0_78 = arith.constant 0 : index
    %112 = vector.load %arg4[%c4, %c0_77, %c0_78] : memref<9x32x64xbf16, #tpu.memory_space<vmem>>, vector<1x32x64xbf16>
    %113 = vector.shape_cast %112 : vector<1x32x64xbf16> to vector<32x64xbf16>
    %cst_79 = arith.constant dense<0.000000e+00> : vector<64x64xf32>
    %114 = tpu.matmul %111, %113, %cst_79 {dimension_numbers = #tpu.dot_dimension_numbers<[1], [0], [0], [1], [0, 0, 1, 1], [], []>} : vector<64x32xbf16>, vector<32x64xbf16>, vector<64x64xf32> -> vector<64x64xf32>
    %115 = arith.addf %109, %114 : vector<64x64xf32>
    %c10 = arith.constant 10 : index
    %c0_80 = arith.constant 0 : index
    %116 = vector.load %arg13[%c10, %c0_80] : memref<82x32xf32, #tpu.memory_space<vmem>>, vector<64x32xf32>
    %c6_i32_81 = arith.constant 6 : i32
    %117 = vector.broadcast %c6_i32_81 : i32 to vector<64x1xi32>
    %118 = arith.cmpi sle, %66, %117 : vector<64x1xi32>
    %cst_82 = arith.constant 0.000000e+00 : f32
    %119 = vector.shape_cast %118 : vector<64x1xi1> to vector<64x1xi1>
    %120 = vector.broadcast %119 : vector<64x1xi1> to vector<64x32xi1>
    %121 = vector.broadcast %cst_82 : f32 to vector<64x32xf32>
    %122 = arith.select %120, %116, %121 : vector<64x32xi1>, vector<64x32xf32>
    %123 = arith.truncf %122 : vector<64x32xf32> to vector<64x32xbf16>
    %c5 = arith.constant 5 : index
    %c0_83 = arith.constant 0 : index
    %c0_84 = arith.constant 0 : index
    %124 = vector.load %arg4[%c5, %c0_83, %c0_84] : memref<9x32x64xbf16, #tpu.memory_space<vmem>>, vector<1x32x64xbf16>
    %125 = vector.shape_cast %124 : vector<1x32x64xbf16> to vector<32x64xbf16>
    %cst_85 = arith.constant dense<0.000000e+00> : vector<64x64xf32>
    %126 = tpu.matmul %123, %125, %cst_85 {dimension_numbers = #tpu.dot_dimension_numbers<[1], [0], [0], [1], [0, 0, 1, 1], [], []>} : vector<64x32xbf16>, vector<32x64xbf16>, vector<64x64xf32> -> vector<64x64xf32>
    %127 = arith.addf %115, %126 : vector<64x64xf32>
    %c16_86 = arith.constant 16 : index
    %c0_87 = arith.constant 0 : index
    %128 = vector.load %arg13[%c16_86, %c0_87] : memref<82x32xf32, #tpu.memory_space<vmem>>, vector<64x32xf32>
    %c1_i32_88 = arith.constant 1 : i32
    %129 = vector.broadcast %c1_i32_88 : i32 to vector<64x1xi32>
    %130 = arith.cmpi sge, %66, %129 : vector<64x1xi32>
    %cst_89 = arith.constant 0.000000e+00 : f32
    %131 = vector.shape_cast %130 : vector<64x1xi1> to vector<64x1xi1>
    %132 = vector.broadcast %131 : vector<64x1xi1> to vector<64x32xi1>
    %133 = vector.broadcast %cst_89 : f32 to vector<64x32xf32>
    %134 = arith.select %132, %128, %133 : vector<64x32xi1>, vector<64x32xf32>
    %135 = arith.truncf %134 : vector<64x32xf32> to vector<64x32xbf16>
    %c6 = arith.constant 6 : index
    %c0_90 = arith.constant 0 : index
    %c0_91 = arith.constant 0 : index
    %136 = vector.load %arg4[%c6, %c0_90, %c0_91] : memref<9x32x64xbf16, #tpu.memory_space<vmem>>, vector<1x32x64xbf16>
    %137 = vector.shape_cast %136 : vector<1x32x64xbf16> to vector<32x64xbf16>
    %cst_92 = arith.constant dense<0.000000e+00> : vector<64x64xf32>
    %138 = tpu.matmul %135, %137, %cst_92 {dimension_numbers = #tpu.dot_dimension_numbers<[1], [0], [0], [1], [0, 0, 1, 1], [], []>} : vector<64x32xbf16>, vector<32x64xbf16>, vector<64x64xf32> -> vector<64x64xf32>
    %139 = arith.addf %127, %138 : vector<64x64xf32>
    %c17_93 = arith.constant 17 : index
    %c0_94 = arith.constant 0 : index
    %140 = vector.load %arg13[%c17_93, %c0_94] : memref<82x32xf32, #tpu.memory_space<vmem>>, vector<64x32xf32>
    %141 = arith.truncf %140 : vector<64x32xf32> to vector<64x32xbf16>
    %c7 = arith.constant 7 : index
    %c0_95 = arith.constant 0 : index
    %c0_96 = arith.constant 0 : index
    %142 = vector.load %arg4[%c7, %c0_95, %c0_96] : memref<9x32x64xbf16, #tpu.memory_space<vmem>>, vector<1x32x64xbf16>
    %143 = vector.shape_cast %142 : vector<1x32x64xbf16> to vector<32x64xbf16>
    %cst_97 = arith.constant dense<0.000000e+00> : vector<64x64xf32>
    %144 = tpu.matmul %141, %143, %cst_97 {dimension_numbers = #tpu.dot_dimension_numbers<[1], [0], [0], [1], [0, 0, 1, 1], [], []>} : vector<64x32xbf16>, vector<32x64xbf16>, vector<64x64xf32> -> vector<64x64xf32>
    %145 = arith.addf %139, %144 : vector<64x64xf32>
    %c18 = arith.constant 18 : index
    %c0_98 = arith.constant 0 : index
    %146 = vector.load %arg13[%c18, %c0_98] : memref<82x32xf32, #tpu.memory_space<vmem>>, vector<64x32xf32>
    %c6_i32_99 = arith.constant 6 : i32
    %147 = vector.broadcast %c6_i32_99 : i32 to vector<64x1xi32>
    %148 = arith.cmpi sle, %66, %147 : vector<64x1xi32>
    %cst_100 = arith.constant 0.000000e+00 : f32
    %149 = vector.shape_cast %148 : vector<64x1xi1> to vector<64x1xi1>
    %150 = vector.broadcast %149 : vector<64x1xi1> to vector<64x32xi1>
    %151 = vector.broadcast %cst_100 : f32 to vector<64x32xf32>
    %152 = arith.select %150, %146, %151 : vector<64x32xi1>, vector<64x32xf32>
    %153 = arith.truncf %152 : vector<64x32xf32> to vector<64x32xbf16>
    %c8_101 = arith.constant 8 : index
    %c0_102 = arith.constant 0 : index
    %c0_103 = arith.constant 0 : index
    %154 = vector.load %arg4[%c8_101, %c0_102, %c0_103] : memref<9x32x64xbf16, #tpu.memory_space<vmem>>, vector<1x32x64xbf16>
    %155 = vector.shape_cast %154 : vector<1x32x64xbf16> to vector<32x64xbf16>
    %cst_104 = arith.constant dense<0.000000e+00> : vector<64x64xf32>
    %156 = tpu.matmul %153, %155, %cst_104 {dimension_numbers = #tpu.dot_dimension_numbers<[1], [0], [0], [1], [0, 0, 1, 1], [], []>} : vector<64x32xbf16>, vector<32x64xbf16>, vector<64x64xf32> -> vector<64x64xf32>
    %157 = arith.addf %145, %156 : vector<64x64xf32>
    %c0_105 = arith.constant 0 : index
    %c0_106 = arith.constant 0 : index
    %158 = vector.load %arg5[%c0_105, %c0_106] : memref<1x64xf32, #tpu.memory_space<vmem>>, vector<1x64xf32>
    %159 = vector.broadcast %158 : vector<1x64xf32> to vector<64x64xf32>
    %160 = arith.addf %157, %159 : vector<64x64xf32>
    %cst_107 = arith.constant 0.000000e+00 : f32
    %161 = vector.broadcast %cst_107 : f32 to vector<64x64xf32>
    %162 = arith.maximumf %160, %161 : vector<64x64xf32>
    %c0_108 = arith.constant 0 : index
    %c0_109 = arith.constant 0 : index
    %163 = vector.load %arg14[%c0_108, %c0_109] : memref<64x64xf32, #tpu.memory_space<vmem>>, vector<64x64xf32>
    tpu.vector_store %arg14[%c0_108, %c0_109], %162 {strides = array<i32>} : memref<64x64xf32, #tpu.memory_space<vmem>>, vector<64x64xf32>,
    %c0_110 = arith.constant 0 : index
    %c0_111 = arith.constant 0 : index
    %164 = vector.load %arg14[%c0_110, %c0_111] : memref<64x64xf32, #tpu.memory_space<vmem>>, vector<1x64xf32>
    %c1_112 = arith.constant 1 : index
    %c0_113 = arith.constant 0 : index
    %165 = vector.load %arg14[%c1_112, %c0_113] : memref<64x64xf32, #tpu.memory_space<vmem>>, vector<1x64xf32>
    %166 = arith.maximumf %164, %165 : vector<1x64xf32>
    %c8_114 = arith.constant 8 : index
    %c0_115 = arith.constant 0 : index
    %167 = vector.load %arg14[%c8_114, %c0_115] : memref<64x64xf32, #tpu.memory_space<vmem>>, vector<1x64xf32>
    %c9_116 = arith.constant 9 : index
    %c0_117 = arith.constant 0 : index
    %168 = vector.load %arg14[%c9_116, %c0_117] : memref<64x64xf32, #tpu.memory_space<vmem>>, vector<1x64xf32>
    %169 = arith.maximumf %167, %168 : vector<1x64xf32>
    %170 = arith.maximumf %166, %169 : vector<1x64xf32>
    %c0_118 = arith.constant 0 : index
    %c0_119 = arith.constant 0 : index
    %171 = vector.load %arg15[%c0_118, %c0_119] : memref<1x1024xf32, #tpu.memory_space<vmem>>, vector<1x64xf32>
    tpu.vector_store %arg15[%c0_118, %c0_119], %170 {strides = array<i32>} : memref<1x1024xf32, #tpu.memory_space<vmem>>, vector<1x64xf32>,
    %c2_120 = arith.constant 2 : index
    %c0_121 = arith.constant 0 : index
    %172 = vector.load %arg14[%c2_120, %c0_121] : memref<64x64xf32, #tpu.memory_space<vmem>>, vector<1x64xf32>
    %c3_122 = arith.constant 3 : index
    %c0_123 = arith.constant 0 : index
    %173 = vector.load %arg14[%c3_122, %c0_123] : memref<64x64xf32, #tpu.memory_space<vmem>>, vector<1x64xf32>
    %174 = arith.maximumf %172, %173 : vector<1x64xf32>
    %c10_124 = arith.constant 10 : index
    %c0_125 = arith.constant 0 : index
    %175 = vector.load %arg14[%c10_124, %c0_125] : memref<64x64xf32, #tpu.memory_space<vmem>>, vector<1x64xf32>
    %c11 = arith.constant 11 : index
    %c0_126 = arith.constant 0 : index
    %176 = vector.load %arg14[%c11, %c0_126] : memref<64x64xf32, #tpu.memory_space<vmem>>, vector<1x64xf32>
    %177 = arith.maximumf %175, %176 : vector<1x64xf32>
    %178 = arith.maximumf %174, %177 : vector<1x64xf32>
    %c0_127 = arith.constant 0 : index
    %c64_128 = arith.constant 64 : index
    %179 = vector.load %arg15[%c0_127, %c64_128] : memref<1x1024xf32, #tpu.memory_space<vmem>>, vector<1x64xf32>
    tpu.vector_store %arg15[%c0_127, %c64_128], %178 {strides = array<i32>} : memref<1x1024xf32, #tpu.memory_space<vmem>>, vector<1x64xf32>,
    %c4_129 = arith.constant 4 : index
    %c0_130 = arith.constant 0 : index
    %180 = vector.load %arg14[%c4_129, %c0_130] : memref<64x64xf32, #tpu.memory_space<vmem>>, vector<1x64xf32>
    %c5_131 = arith.constant 5 : index
    %c0_132 = arith.constant 0 : index
    %181 = vector.load %arg14[%c5_131, %c0_132] : memref<64x64xf32, #tpu.memory_space<vmem>>, vector<1x64xf32>
    %182 = arith.maximumf %180, %181 : vector<1x64xf32>
    %c12 = arith.constant 12 : index
    %c0_133 = arith.constant 0 : index
    %183 = vector.load %arg14[%c12, %c0_133] : memref<64x64xf32, #tpu.memory_space<vmem>>, vector<1x64xf32>
    %c13 = arith.constant 13 : index
    %c0_134 = arith.constant 0 : index
    %184 = vector.load %arg14[%c13, %c0_134] : memref<64x64xf32, #tpu.memory_space<vmem>>, vector<1x64xf32>
    %185 = arith.maximumf %183, %184 : vector<1x64xf32>
    %186 = arith.maximumf %182, %185 : vector<1x64xf32>
    %c0_135 = arith.constant 0 : index
    %c128 = arith.constant 128 : index
    %187 = vector.load %arg15[%c0_135, %c128] : memref<1x1024xf32, #tpu.memory_space<vmem>>, vector<1x64xf32>
    tpu.vector_store %arg15[%c0_135, %c128], %186 {strides = array<i32>} : memref<1x1024xf32, #tpu.memory_space<vmem>>, vector<1x64xf32>,
    %c6_136 = arith.constant 6 : index
    %c0_137 = arith.constant 0 : index
    %188 = vector.load %arg14[%c6_136, %c0_137] : memref<64x64xf32, #tpu.memory_space<vmem>>, vector<1x64xf32>
    %c7_138 = arith.constant 7 : index
    %c0_139 = arith.constant 0 : index
    %189 = vector.load %arg14[%c7_138, %c0_139] : memref<64x64xf32, #tpu.memory_space<vmem>>, vector<1x64xf32>
    %190 = arith.maximumf %188, %189 : vector<1x64xf32>
    %c14 = arith.constant 14 : index
    %c0_140 = arith.constant 0 : index
    %191 = vector.load %arg14[%c14, %c0_140] : memref<64x64xf32, #tpu.memory_space<vmem>>, vector<1x64xf32>
    %c15 = arith.constant 15 : index
    %c0_141 = arith.constant 0 : index
    %192 = vector.load %arg14[%c15, %c0_141] : memref<64x64xf32, #tpu.memory_space<vmem>>, vector<1x64xf32>
    %193 = arith.maximumf %191, %192 : vector<1x64xf32>
    %194 = arith.maximumf %190, %193 : vector<1x64xf32>
    %c0_142 = arith.constant 0 : index
    %c192 = arith.constant 192 : index
    %195 = vector.load %arg15[%c0_142, %c192] : memref<1x1024xf32, #tpu.memory_space<vmem>>, vector<1x64xf32>
    tpu.vector_store %arg15[%c0_142, %c192], %194 {strides = array<i32>} : memref<1x1024xf32, #tpu.memory_space<vmem>>, vector<1x64xf32>,
    %c16_143 = arith.constant 16 : index
    %c0_144 = arith.constant 0 : index
    %196 = vector.load %arg14[%c16_143, %c0_144] : memref<64x64xf32, #tpu.memory_space<vmem>>, vector<1x64xf32>
    %c17_145 = arith.constant 17 : index
    %c0_146 = arith.constant 0 : index
    %197 = vector.load %arg14[%c17_145, %c0_146] : memref<64x64xf32, #tpu.memory_space<vmem>>, vector<1x64xf32>
    %198 = arith.maximumf %196, %197 : vector<1x64xf32>
    %c24_147 = arith.constant 24 : index
    %c0_148 = arith.constant 0 : index
    %199 = vector.load %arg14[%c24_147, %c0_148] : memref<64x64xf32, #tpu.memory_space<vmem>>, vector<1x64xf32>
    %c25_149 = arith.constant 25 : index
    %c0_150 = arith.constant 0 : index
    %200 = vector.load %arg14[%c25_149, %c0_150] : memref<64x64xf32, #tpu.memory_space<vmem>>, vector<1x64xf32>
    %201 = arith.maximumf %199, %200 : vector<1x64xf32>
    %202 = arith.maximumf %198, %201 : vector<1x64xf32>
    %c0_151 = arith.constant 0 : index
    %c256 = arith.constant 256 : index
    %203 = vector.load %arg15[%c0_151, %c256] : memref<1x1024xf32, #tpu.memory_space<vmem>>, vector<1x64xf32>
    tpu.vector_store %arg15[%c0_151, %c256], %202 {strides = array<i32>} : memref<1x1024xf32, #tpu.memory_space<vmem>>, vector<1x64xf32>,
    %c18_152 = arith.constant 18 : index
    %c0_153 = arith.constant 0 : index
    %204 = vector.load %arg14[%c18_152, %c0_153] : memref<64x64xf32, #tpu.memory_space<vmem>>, vector<1x64xf32>
    %c19 = arith.constant 19 : index
    %c0_154 = arith.constant 0 : index
    %205 = vector.load %arg14[%c19, %c0_154] : memref<64x64xf32, #tpu.memory_space<vmem>>, vector<1x64xf32>
    %206 = arith.maximumf %204, %205 : vector<1x64xf32>
    %c26 = arith.constant 26 : index
    %c0_155 = arith.constant 0 : index
    %207 = vector.load %arg14[%c26, %c0_155] : memref<64x64xf32, #tpu.memory_space<vmem>>, vector<1x64xf32>
    %c27 = arith.constant 27 : index
    %c0_156 = arith.constant 0 : index
    %208 = vector.load %arg14[%c27, %c0_156] : memref<64x64xf32, #tpu.memory_space<vmem>>, vector<1x64xf32>
    %209 = arith.maximumf %207, %208 : vector<1x64xf32>
    %210 = arith.maximumf %206, %209 : vector<1x64xf32>
    %c0_157 = arith.constant 0 : index
    %c320 = arith.constant 320 : index
    %211 = vector.load %arg15[%c0_157, %c320] : memref<1x1024xf32, #tpu.memory_space<vmem>>, vector<1x64xf32>
    tpu.vector_store %arg15[%c0_157, %c320], %210 {strides = array<i32>} : memref<1x1024xf32, #tpu.memory_space<vmem>>, vector<1x64xf32>,
    %c20 = arith.constant 20 : index
    %c0_158 = arith.constant 0 : index
    %212 = vector.load %arg14[%c20, %c0_158] : memref<64x64xf32, #tpu.memory_space<vmem>>, vector<1x64xf32>
    %c21 = arith.constant 21 : index
    %c0_159 = arith.constant 0 : index
    %213 = vector.load %arg14[%c21, %c0_159] : memref<64x64xf32, #tpu.memory_space<vmem>>, vector<1x64xf32>
    %214 = arith.maximumf %212, %213 : vector<1x64xf32>
    %c28 = arith.constant 28 : index
    %c0_160 = arith.constant 0 : index
    %215 = vector.load %arg14[%c28, %c0_160] : memref<64x64xf32, #tpu.memory_space<vmem>>, vector<1x64xf32>
    %c29 = arith.constant 29 : index
    %c0_161 = arith.constant 0 : index
    %216 = vector.load %arg14[%c29, %c0_161] : memref<64x64xf32, #tpu.memory_space<vmem>>, vector<1x64xf32>
    %217 = arith.maximumf %215, %216 : vector<1x64xf32>
    %218 = arith.maximumf %214, %217 : vector<1x64xf32>
    %c0_162 = arith.constant 0 : index
    %c384 = arith.constant 384 : index
    %219 = vector.load %arg15[%c0_162, %c384] : memref<1x1024xf32, #tpu.memory_space<vmem>>, vector<1x64xf32>
    tpu.vector_store %arg15[%c0_162, %c384], %218 {strides = array<i32>} : memref<1x1024xf32, #tpu.memory_space<vmem>>, vector<1x64xf32>,
    %c22 = arith.constant 22 : index
    %c0_163 = arith.constant 0 : index
    %220 = vector.load %arg14[%c22, %c0_163] : memref<64x64xf32, #tpu.memory_space<vmem>>, vector<1x64xf32>
    %c23 = arith.constant 23 : index
    %c0_164 = arith.constant 0 : index
    %221 = vector.load %arg14[%c23, %c0_164] : memref<64x64xf32, #tpu.memory_space<vmem>>, vector<1x64xf32>
    %222 = arith.maximumf %220, %221 : vector<1x64xf32>
    %c30 = arith.constant 30 : index
    %c0_165 = arith.constant 0 : index
    %223 = vector.load %arg14[%c30, %c0_165] : memref<64x64xf32, #tpu.memory_space<vmem>>, vector<1x64xf32>
    %c31 = arith.constant 31 : index
    %c0_166 = arith.constant 0 : index
    %224 = vector.load %arg14[%c31, %c0_166] : memref<64x64xf32, #tpu.memory_space<vmem>>, vector<1x64xf32>
    %225 = arith.maximumf %223, %224 : vector<1x64xf32>
    %226 = arith.maximumf %222, %225 : vector<1x64xf32>
    %c0_167 = arith.constant 0 : index
    %c448 = arith.constant 448 : index
    %227 = vector.load %arg15[%c0_167, %c448] : memref<1x1024xf32, #tpu.memory_space<vmem>>, vector<1x64xf32>
    tpu.vector_store %arg15[%c0_167, %c448], %226 {strides = array<i32>} : memref<1x1024xf32, #tpu.memory_space<vmem>>, vector<1x64xf32>,
    %c32_168 = arith.constant 32 : index
    %c0_169 = arith.constant 0 : index
    %228 = vector.load %arg14[%c32_168, %c0_169] : memref<64x64xf32, #tpu.memory_space<vmem>>, vector<1x64xf32>
    %c33_170 = arith.constant 33 : index
    %c0_171 = arith.constant 0 : index
    %229 = vector.load %arg14[%c33_170, %c0_171] : memref<64x64xf32, #tpu.memory_space<vmem>>, vector<1x64xf32>
    %230 = arith.maximumf %228, %229 : vector<1x64xf32>
    %c40_172 = arith.constant 40 : index
    %c0_173 = arith.constant 0 : index
    %231 = vector.load %arg14[%c40_172, %c0_173] : memref<64x64xf32, #tpu.memory_space<vmem>>, vector<1x64xf32>
    %c41_174 = arith.constant 41 : index
    %c0_175 = arith.constant 0 : index
    %232 = vector.load %arg14[%c41_174, %c0_175] : memref<64x64xf32, #tpu.memory_space<vmem>>, vector<1x64xf32>
    %233 = arith.maximumf %231, %232 : vector<1x64xf32>
    %234 = arith.maximumf %230, %233 : vector<1x64xf32>
    %c0_176 = arith.constant 0 : index
    %c512 = arith.constant 512 : index
    %235 = vector.load %arg15[%c0_176, %c512] : memref<1x1024xf32, #tpu.memory_space<vmem>>, vector<1x64xf32>
    tpu.vector_store %arg15[%c0_176, %c512], %234 {strides = array<i32>} : memref<1x1024xf32, #tpu.memory_space<vmem>>, vector<1x64xf32>,
    %c34 = arith.constant 34 : index
    %c0_177 = arith.constant 0 : index
    %236 = vector.load %arg14[%c34, %c0_177] : memref<64x64xf32, #tpu.memory_space<vmem>>, vector<1x64xf32>
    %c35 = arith.constant 35 : index
    %c0_178 = arith.constant 0 : index
    %237 = vector.load %arg14[%c35, %c0_178] : memref<64x64xf32, #tpu.memory_space<vmem>>, vector<1x64xf32>
    %238 = arith.maximumf %236, %237 : vector<1x64xf32>
    %c42 = arith.constant 42 : index
    %c0_179 = arith.constant 0 : index
    %239 = vector.load %arg14[%c42, %c0_179] : memref<64x64xf32, #tpu.memory_space<vmem>>, vector<1x64xf32>
    %c43 = arith.constant 43 : index
    %c0_180 = arith.constant 0 : index
    %240 = vector.load %arg14[%c43, %c0_180] : memref<64x64xf32, #tpu.memory_space<vmem>>, vector<1x64xf32>
    %241 = arith.maximumf %239, %240 : vector<1x64xf32>
    %242 = arith.maximumf %238, %241 : vector<1x64xf32>
    %c0_181 = arith.constant 0 : index
    %c576 = arith.constant 576 : index
    %243 = vector.load %arg15[%c0_181, %c576] : memref<1x1024xf32, #tpu.memory_space<vmem>>, vector<1x64xf32>
    tpu.vector_store %arg15[%c0_181, %c576], %242 {strides = array<i32>} : memref<1x1024xf32, #tpu.memory_space<vmem>>, vector<1x64xf32>,
    %c36 = arith.constant 36 : index
    %c0_182 = arith.constant 0 : index
    %244 = vector.load %arg14[%c36, %c0_182] : memref<64x64xf32, #tpu.memory_space<vmem>>, vector<1x64xf32>
    %c37 = arith.constant 37 : index
    %c0_183 = arith.constant 0 : index
    %245 = vector.load %arg14[%c37, %c0_183] : memref<64x64xf32, #tpu.memory_space<vmem>>, vector<1x64xf32>
    %246 = arith.maximumf %244, %245 : vector<1x64xf32>
    %c44 = arith.constant 44 : index
    %c0_184 = arith.constant 0 : index
    %247 = vector.load %arg14[%c44, %c0_184] : memref<64x64xf32, #tpu.memory_space<vmem>>, vector<1x64xf32>
    %c45 = arith.constant 45 : index
    %c0_185 = arith.constant 0 : index
    %248 = vector.load %arg14[%c45, %c0_185] : memref<64x64xf32, #tpu.memory_space<vmem>>, vector<1x64xf32>
    %249 = arith.maximumf %247, %248 : vector<1x64xf32>
    %250 = arith.maximumf %246, %249 : vector<1x64xf32>
    %c0_186 = arith.constant 0 : index
    %c640 = arith.constant 640 : index
    %251 = vector.load %arg15[%c0_186, %c640] : memref<1x1024xf32, #tpu.memory_space<vmem>>, vector<1x64xf32>
    tpu.vector_store %arg15[%c0_186, %c640], %250 {strides = array<i32>} : memref<1x1024xf32, #tpu.memory_space<vmem>>, vector<1x64xf32>,
    %c38 = arith.constant 38 : index
    %c0_187 = arith.constant 0 : index
    %252 = vector.load %arg14[%c38, %c0_187] : memref<64x64xf32, #tpu.memory_space<vmem>>, vector<1x64xf32>
    %c39 = arith.constant 39 : index
    %c0_188 = arith.constant 0 : index
    %253 = vector.load %arg14[%c39, %c0_188] : memref<64x64xf32, #tpu.memory_space<vmem>>, vector<1x64xf32>
    %254 = arith.maximumf %252, %253 : vector<1x64xf32>
    %c46 = arith.constant 46 : index
    %c0_189 = arith.constant 0 : index
    %255 = vector.load %arg14[%c46, %c0_189] : memref<64x64xf32, #tpu.memory_space<vmem>>, vector<1x64xf32>
    %c47 = arith.constant 47 : index
    %c0_190 = arith.constant 0 : index
    %256 = vector.load %arg14[%c47, %c0_190] : memref<64x64xf32, #tpu.memory_space<vmem>>, vector<1x64xf32>
    %257 = arith.maximumf %255, %256 : vector<1x64xf32>
    %258 = arith.maximumf %254, %257 : vector<1x64xf32>
    %c0_191 = arith.constant 0 : index
    %c704 = arith.constant 704 : index
    %259 = vector.load %arg15[%c0_191, %c704] : memref<1x1024xf32, #tpu.memory_space<vmem>>, vector<1x64xf32>
    tpu.vector_store %arg15[%c0_191, %c704], %258 {strides = array<i32>} : memref<1x1024xf32, #tpu.memory_space<vmem>>, vector<1x64xf32>,
    %c48_192 = arith.constant 48 : index
    %c0_193 = arith.constant 0 : index
    %260 = vector.load %arg14[%c48_192, %c0_193] : memref<64x64xf32, #tpu.memory_space<vmem>>, vector<1x64xf32>
    %c49_194 = arith.constant 49 : index
    %c0_195 = arith.constant 0 : index
    %261 = vector.load %arg14[%c49_194, %c0_195] : memref<64x64xf32, #tpu.memory_space<vmem>>, vector<1x64xf32>
    %262 = arith.maximumf %260, %261 : vector<1x64xf32>
    %c56_196 = arith.constant 56 : index
    %c0_197 = arith.constant 0 : index
    %263 = vector.load %arg14[%c56_196, %c0_197] : memref<64x64xf32, #tpu.memory_space<vmem>>, vector<1x64xf32>
    %c57_198 = arith.constant 57 : index
    %c0_199 = arith.constant 0 : index
    %264 = vector.load %arg14[%c57_198, %c0_199] : memref<64x64xf32, #tpu.memory_space<vmem>>, vector<1x64xf32>
    %265 = arith.maximumf %263, %264 : vector<1x64xf32>
    %266 = arith.maximumf %262, %265 : vector<1x64xf32>
    %c0_200 = arith.constant 0 : index
    %c768 = arith.constant 768 : index
    %267 = vector.load %arg15[%c0_200, %c768] : memref<1x1024xf32, #tpu.memory_space<vmem>>, vector<1x64xf32>
    tpu.vector_store %arg15[%c0_200, %c768], %266 {strides = array<i32>} : memref<1x1024xf32, #tpu.memory_space<vmem>>, vector<1x64xf32>,
    %c50 = arith.constant 50 : index
    %c0_201 = arith.constant 0 : index
    %268 = vector.load %arg14[%c50, %c0_201] : memref<64x64xf32, #tpu.memory_space<vmem>>, vector<1x64xf32>
    %c51 = arith.constant 51 : index
    %c0_202 = arith.constant 0 : index
    %269 = vector.load %arg14[%c51, %c0_202] : memref<64x64xf32, #tpu.memory_space<vmem>>, vector<1x64xf32>
    %270 = arith.maximumf %268, %269 : vector<1x64xf32>
    %c58 = arith.constant 58 : index
    %c0_203 = arith.constant 0 : index
    %271 = vector.load %arg14[%c58, %c0_203] : memref<64x64xf32, #tpu.memory_space<vmem>>, vector<1x64xf32>
    %c59 = arith.constant 59 : index
    %c0_204 = arith.constant 0 : index
    %272 = vector.load %arg14[%c59, %c0_204] : memref<64x64xf32, #tpu.memory_space<vmem>>, vector<1x64xf32>
    %273 = arith.maximumf %271, %272 : vector<1x64xf32>
    %274 = arith.maximumf %270, %273 : vector<1x64xf32>
    %c0_205 = arith.constant 0 : index
    %c832 = arith.constant 832 : index
    %275 = vector.load %arg15[%c0_205, %c832] : memref<1x1024xf32, #tpu.memory_space<vmem>>, vector<1x64xf32>
    tpu.vector_store %arg15[%c0_205, %c832], %274 {strides = array<i32>} : memref<1x1024xf32, #tpu.memory_space<vmem>>, vector<1x64xf32>,
    %c52 = arith.constant 52 : index
    %c0_206 = arith.constant 0 : index
    %276 = vector.load %arg14[%c52, %c0_206] : memref<64x64xf32, #tpu.memory_space<vmem>>, vector<1x64xf32>
    %c53 = arith.constant 53 : index
    %c0_207 = arith.constant 0 : index
    %277 = vector.load %arg14[%c53, %c0_207] : memref<64x64xf32, #tpu.memory_space<vmem>>, vector<1x64xf32>
    %278 = arith.maximumf %276, %277 : vector<1x64xf32>
    %c60 = arith.constant 60 : index
    %c0_208 = arith.constant 0 : index
    %279 = vector.load %arg14[%c60, %c0_208] : memref<64x64xf32, #tpu.memory_space<vmem>>, vector<1x64xf32>
    %c61 = arith.constant 61 : index
    %c0_209 = arith.constant 0 : index
    %280 = vector.load %arg14[%c61, %c0_209] : memref<64x64xf32, #tpu.memory_space<vmem>>, vector<1x64xf32>
    %281 = arith.maximumf %279, %280 : vector<1x64xf32>
    %282 = arith.maximumf %278, %281 : vector<1x64xf32>
    %c0_210 = arith.constant 0 : index
    %c896 = arith.constant 896 : index
    %283 = vector.load %arg15[%c0_210, %c896] : memref<1x1024xf32, #tpu.memory_space<vmem>>, vector<1x64xf32>
    tpu.vector_store %arg15[%c0_210, %c896], %282 {strides = array<i32>} : memref<1x1024xf32, #tpu.memory_space<vmem>>, vector<1x64xf32>,
    %c54 = arith.constant 54 : index
    %c0_211 = arith.constant 0 : index
    %284 = vector.load %arg14[%c54, %c0_211] : memref<64x64xf32, #tpu.memory_space<vmem>>, vector<1x64xf32>
    %c55 = arith.constant 55 : index
    %c0_212 = arith.constant 0 : index
    %285 = vector.load %arg14[%c55, %c0_212] : memref<64x64xf32, #tpu.memory_space<vmem>>, vector<1x64xf32>
    %286 = arith.maximumf %284, %285 : vector<1x64xf32>
    %c62 = arith.constant 62 : index
    %c0_213 = arith.constant 0 : index
    %287 = vector.load %arg14[%c62, %c0_213] : memref<64x64xf32, #tpu.memory_space<vmem>>, vector<1x64xf32>
    %c63 = arith.constant 63 : index
    %c0_214 = arith.constant 0 : index
    %288 = vector.load %arg14[%c63, %c0_214] : memref<64x64xf32, #tpu.memory_space<vmem>>, vector<1x64xf32>
    %289 = arith.maximumf %287, %288 : vector<1x64xf32>
    %290 = arith.maximumf %286, %289 : vector<1x64xf32>
    %c0_215 = arith.constant 0 : index
    %c960 = arith.constant 960 : index
    %291 = vector.load %arg15[%c0_215, %c960] : memref<1x1024xf32, #tpu.memory_space<vmem>>, vector<1x64xf32>
    tpu.vector_store %arg15[%c0_215, %c960], %290 {strides = array<i32>} : memref<1x1024xf32, #tpu.memory_space<vmem>>, vector<1x64xf32>,
    %c0_216 = arith.constant 0 : index
    %c0_217 = arith.constant 0 : index
    %292 = vector.load %arg15[%c0_216, %c0_217] : memref<1x1024xf32, #tpu.memory_space<vmem>>, vector<1x1024xf32>
    %293 = arith.truncf %292 : vector<1x1024xf32> to vector<1x1024xbf16>
    %c0_218 = arith.constant 0 : index
    %c0_219 = arith.constant 0 : index
    %294 = vector.load %arg6[%c0_218, %c0_219] : memref<1024x256xbf16, #tpu.memory_space<vmem>>, vector<1024x256xbf16>
    %cst_220 = arith.constant dense<0.000000e+00> : vector<1x256xf32>
    %295 = tpu.matmul %293, %294, %cst_220 {dimension_numbers = #tpu.dot_dimension_numbers<[1], [0], [0], [1], [0, 0, 1, 1], [], []>} : vector<1x1024xbf16>, vector<1024x256xbf16>, vector<1x256xf32> -> vector<1x256xf32>
    %c0_221 = arith.constant 0 : index
    %c0_222 = arith.constant 0 : index
    %296 = vector.load %arg7[%c0_221, %c0_222] : memref<1x256xf32, #tpu.memory_space<vmem>>, vector<1x256xf32>
    %297 = arith.addf %295, %296 : vector<1x256xf32>
    %cst_223 = arith.constant 0.000000e+00 : f32
    %298 = vector.broadcast %cst_223 : f32 to vector<1x256xf32>
    %299 = arith.maximumf %297, %298 : vector<1x256xf32>
    %300 = arith.truncf %299 : vector<1x256xf32> to vector<1x256xbf16>
    %c0_224 = arith.constant 0 : index
    %c0_225 = arith.constant 0 : index
    %301 = vector.load %arg8[%c0_224, %c0_225] : memref<256x128xbf16, #tpu.memory_space<vmem>>, vector<256x128xbf16>
    %cst_226 = arith.constant dense<0.000000e+00> : vector<1x128xf32>
    %302 = tpu.matmul %300, %301, %cst_226 {dimension_numbers = #tpu.dot_dimension_numbers<[1], [0], [0], [1], [0, 0, 1, 1], [], []>} : vector<1x256xbf16>, vector<256x128xbf16>, vector<1x128xf32> -> vector<1x128xf32>
    %c0_227 = arith.constant 0 : index
    %c0_228 = arith.constant 0 : index
    %303 = vector.load %arg9[%c0_227, %c0_228] : memref<1x128xf32, #tpu.memory_space<vmem>>, vector<1x128xf32>
    %304 = arith.addf %302, %303 : vector<1x128xf32>
    %c0_229 = arith.constant 0 : index
    %c0_230 = arith.constant 0 : index
    %c0_231 = arith.constant 0 : index
    %305 = vector.load %arg10[%c0_229, %c0_230, %c0_231] : memref<1x1x128xf32, #tpu.memory_space<vmem>>, vector<1x1x128xf32>
    %306 = vector.shape_cast %305 : vector<1x1x128xf32> to vector<1x128xf32>
    %307 = vector.shape_cast %304 : vector<1x128xf32> to vector<1x1x128xf32>
    tpu.vector_store %arg10[%c0_229, %c0_230, %c0_231], %307 {strides = array<i32>} : memref<1x1x128xf32, #tpu.memory_space<vmem>>, vector<1x1x128xf32>,
    return
  }
  func.func @transform_0(%arg0: i32) -> (i32, i32, i32) {
    %c0_i32 = arith.constant 0 : i32
    %c0_i32_0 = arith.constant 0 : i32
    %c0_i32_1 = arith.constant 0 : i32
    return %arg0, %c0_i32, %c0_i32_0 : i32, i32, i32
  }
  func.func @transform_1(%arg0: i32) -> (i32, i32) {
    %c0_i32 = arith.constant 0 : i32
    %c0_i32_0 = arith.constant 0 : i32
    %c0_i32_1 = arith.constant 0 : i32
    return %c0_i32, %c0_i32_0 : i32, i32
  }
  func.func @transform_2(%arg0: i32) -> (i32, i32) {
    %c0_i32 = arith.constant 0 : i32
    %c0_i32_0 = arith.constant 0 : i32
    %c0_i32_1 = arith.constant 0 : i32
    return %c0_i32, %c0_i32_0 : i32, i32
  }
  func.func @transform_3(%arg0: i32) -> (i32, i32, i32) {
    %c0_i32 = arith.constant 0 : i32
    %c0_i32_0 = arith.constant 0 : i32
    %c0_i32_1 = arith.constant 0 : i32
    %c0_i32_2 = arith.constant 0 : i32
    return %c0_i32, %c0_i32_0, %c0_i32_1 : i32, i32, i32
  }
  func.func @transform_4(%arg0: i32) -> (i32, i32) {
    %c0_i32 = arith.constant 0 : i32
    %c0_i32_0 = arith.constant 0 : i32
    %c0_i32_1 = arith.constant 0 : i32
    return %c0_i32, %c0_i32_0 : i32, i32
  }
  func.func @transform_5(%arg0: i32) -> (i32, i32) {
    %c0_i32 = arith.constant 0 : i32
    %c0_i32_0 = arith.constant 0 : i32
    %c0_i32_1 = arith.constant 0 : i32
    return %c0_i32, %c0_i32_0 : i32, i32
  }
  func.func @transform_6(%arg0: i32) -> (i32, i32) {
    %c0_i32 = arith.constant 0 : i32
    %c0_i32_0 = arith.constant 0 : i32
    %c0_i32_1 = arith.constant 0 : i32
    return %c0_i32, %c0_i32_0 : i32, i32
  }
  func.func @transform_7(%arg0: i32) -> (i32, i32) {
    %c0_i32 = arith.constant 0 : i32
    %c0_i32_0 = arith.constant 0 : i32
    %c0_i32_1 = arith.constant 0 : i32
    return %c0_i32, %c0_i32_0 : i32, i32
  }
  func.func @transform_8(%arg0: i32) -> (i32, i32) {
    %c0_i32 = arith.constant 0 : i32
    %c0_i32_0 = arith.constant 0 : i32
    %c0_i32_1 = arith.constant 0 : i32
    return %c0_i32, %c0_i32_0 : i32, i32
  }
  func.func @transform_9(%arg0: i32) -> (i32, i32, i32) {
    %c0_i32 = arith.constant 0 : i32
    %c0_i32_0 = arith.constant 0 : i32
    %c0_i32_1 = arith.constant 0 : i32
    return %arg0, %c0_i32, %c0_i32_0 : i32, i32, i32
  }
}

</mosaic_0001>

<bundles_post_ra>
// kernel: simple_cnn_forward.1
= control target key start
LH: loop header
LB: loop body
LE: loop exit
PB: predicated region body
PF: predicated region fallthrough
CT: control target
= control target key end

     0   :  { %14 = vsyncpa [#allocation8], 0  ;;  %s5542_s0 = inlined_call_operand.vmem [shape: bf16[2,256,9], index: 0, kind: input, shape index: {}]   ;;  %s5543_s1 = inlined_call_operand.vmem [shape: bf16[9,32], index: 1, kind: input, shape index: {}]   ;;  %s5544_s2 = inlined_call_operand.vmem [shape: f32[1,32], index: 2, kind: input, shape index: {}]   ;;  %s5545_s3 = inlined_call_operand.vmem [shape: bf16[9,32,64], index: 3, kind: input, shape index: {}]   ;;  %s5546_s4 = inlined_call_operand.vmem [shape: f32[1,64], index: 4, kind: input, shape index: {}]   ;;  %s5547_s5 = inlined_call_operand.hbm [shape: bf16[1024,256], index: 5, kind: input, shape index: {}]   ;;  %s5548_s6 = inlined_call_operand.vmem [shape: f32[1,256], index: 6, kind: input, shape index: {}]   ;;  %s5549_s7 = inlined_call_operand.vmem [shape: bf16[256,128], index: 7, kind: input, shape index: {}]   ;;  %s5550_s8 = inlined_call_operand.vmem [shape: f32[1,128], index: 8, kind: input, shape index: {}]   ;;  %s5551_s9 = inlined_call_operand.hbm [shape: f32[2,1,128], index: 9, kind: output, shape index: {}]  }
   0x1   :  { %15 = vsyncpa [#allocation9], 0 }
   0x2   :  { %17 = vsyncpa [#allocation9 + $0x1], 0  ;;  %s4696_s30 = smov 0   ;;  %s4698_s10 = smov 0  }
   0x3   :  { %s4700_s11 = smov 0   ;;  %s4702_s12 = smov 0  }
   0x4 LB: > { %s4717_s13 = sadd.s32 4294967295, %s4636_s12   ;;  %s3655_s14 = sadd.s32 4294967294, %s4636_s12   ;;  %s4636_s12 = sphi %s4702_s12, %s5605_s12   ;;  %s4632_s11 = sphi %s4700_s11, %s5604_s11   ;;  %s4628_s10 = sphi %s4698_s10, %s5603_s10   ;;  %s4624_s30 = sphi %s4696_s30, %s5602_s30  }
   0x5   : > { %s4721_s15 = sadd.s32 1, %s4636_s12   ;;  %s224_s16 = sadd.s32 1, %s4632_s11 }
   0x6   : > { %s221_s17 = ssub.s32 %s4636_s12, %s4721_s15  ;;  %p234_p0 = scmp.ne.s32.totalorder %s4632_s11, %s4628_s10 }
   0x7   : > { %p222_p1 = scmp.eq.s32.totalorder %s221_s17, 0  ;;  %p235_p2 = scmp.eq.s32.totalorder %s4717_s13, 1 }
   0x8   : > { %p240_p3 = scmp.ne.s32.totalorder %s4628_s10, %s4624_s30  ;;  %p241_p4 = scmp.eq.s32.totalorder %s3655_s14, 1 }
   0x9   : > { %s4732_s18 = scalar_select %p222_p1, %s4632_s11, %s224_s16  }
   0xa   : > { %p4734_p5 = por %p235_p2, %p234_p0  ;;  %p4738_p6 = por %p241_p4, %p240_p3 }
   0xb   : > { %p3656_p7 = scmp.ge.s32.totalorder %s4636_s12, 1  ;;  %p248_p8 = scmp.lt.s32.totalorder %s4636_s12, 3 }
   0xc   : > { %s5556_s19 = scalar_select %p4734_p5, 1, 0 }
   0xd   : > { %s5557_s20 = scalar_select %p4738_p6, 1, 0 }
   0xe   : > { %p5552_p9 = scmp.eq.s32.totalorder %s4717_s13, 0  ;;  %p4745_p10 = pnand %p3656_p7, %p248_p8 }
   0xf   : > { %s4638_s22 = smov [#allocation7]   ;;  %s4542_s27 = scalar_lea.hbm %s5547_s5, 16384 }
  0x10   : > { %s5558_s21 = scalar_select %p4745_p10, 1, 0 }
  0x11   : > { %s272_s23 = sshll.u32 %s4638_s22, 4  ;;  %p4249_p11 = pneg %p4745_p10  ;;  %s273_s23 = int_to_ptr.vmem [resolvable:$true] %s272_s23 }
  0x12   : > { %p4543_p13 = scmp.ne.s32.totalorder %s5547_s5, %s4542_s27  ;;  %p4549_p3 = scmp.lt.u32.totalorder %s4542_s27, %s5547_s5 }
  0x13   : > { %p4753_p12 = pnand %p5552_p9, %p4249_p11 }
  0x15   : > { %p4544_p0 = pneg %p4753_p12 }
  0x17   : > { %p4545_p1 = pnand %p4544_p0, %p4543_p13 }
  0x19   : > { %p4546_p2 = pneg %p4545_p1 }
  0x1b   : > { %p4551_p4 = pnand %p4549_p3, %p4546_p2 }
  0x1d   : > { %4554 = shalt.err (!%p4551_p4)
}
  0x1e   : > { %s4555_s17 = scalar_lea.vmem %s273_s23, 16384  ;;  %p4563_p9 = scmp.lt.s32.totalorder %s273_s23, %s273_s23 }
  0x1f   : > { %p4556_p7 = scmp.ne.s32.totalorder %s273_s23, %s4555_s17  ;;  %p4564_p6 = scmp.lt.s32.totalorder %s4555_s17, %s4555_s17 }
  0x21   : > { %p4558_p8 = pnand %p4556_p7, %p4544_p0  ;;  %p4565_p5 = por %p4564_p6, %p4563_p9 }
  0x23   : > { %p4559_p11 = pneg %p4558_p8 }
  0x25   : > { %p4566_p10 = pnand %p4565_p5, %p4559_p11 }
  0x27   : > { %4569 = shalt.err (!%p4566_p10)
}
  0x28   : > { %s4639_s22 = smov 128   ;;  %s4640_s25 = smov 8  }
  0x29   : > { %4252 = dma.hbm_to_vmem [thread:$0]  (!%p4753_p12), %s5547_s5, 16384, %s273_s23, [#allocation8], %s4639_s22, %s4639_s22, %s4640_s25  }
  0x2a   : > { %p5560_p13 = scmp.ne.s32.totalorder %s5558_s21, 0 }
  0x2b   : > { %p5561_p1 = scmp.eq.s32.totalorder (!%p5560_p13), %s4717_s13, 0 }
  0x2c   : > { %305 = sbr.rel (%p5560_p13) target bundleno = 1433 (0x599), region = 56 }
  0x33   : > { %4615 = dma.done.wait (%p5561_p1), [#allocation8], 16384   ;;  %p5562_p0 = pmov %p5561_p1 }
  0x34   : > { %vm521_vm0 = vcmask 1043456   ;;  %p340_p5 = scmp.lt.s32.totalorder %s4717_s13, 1  ;;  %vm522_vm1 = vcmask 1044480   ;;  %v4641_v0 = vmov 65535   ;;  %vm472_vm2 = vcmask 72704   ;;  %v4316_v22 = vld [vmem:[%s5545_s3 + $0x10] sm:$0xff]  }
  0x35   : > { %4617 = vsyncadd (%p5562_p0), [#allocation8], 4294950912  ;;  %v523_v1 = vsel %vm521_vm0, 4294967295, %v4641_v0  ;;  %v4299_v3 = vld [vmem:[%s5543_s1] sm:$0x1f]   ;;  %vm721_vm3 = vcmask 261120   ;;  %4059 = vmatprep.subr.bf16.mxu1 %v4316_v22 }
  0x36   : > { %s341_s27 = scalar_select %p340_p5, %s4717_s13, 1  ;;  %v524_v2 = vsel %vm522_vm1, %v523_v1, 0  ;;  %vm850_vm4 = vcmask 253952   ;;  %v4642_v21 = vmov 0.0   ;;  %4060 = vmatpush3.bf16.msra.mxu1 %v4316_v22  ;;  %v4317_v23 = vld [vmem:[%s5545_s3 + $0x18] sm:$0xff]   ;;  %v4832_v24 = vld [vmem:[%s5545_s3] sm:$0xff]  }
  0x37   : > { %v526_v5 = vand.u32 %v4299_v3, %v524_v2  ;;  %849 = vst.msk [vmem:[#allocation4] sm:$0xff] %vm721_vm3, %v4642_v21  ;;  %852 = vst.msk [vmem:[#allocation4 + $0x49] sm:$0xff] %vm721_vm3, %v4642_v21  ;;  %4061 = vmatprep.subr.bf16.mxu1 %v4317_v23  ;;  %v4838_v25 = vld [vmem:[%s5544_s2] ss:$0 sm:$0xff]  ;;  %s4644_s28 = smov 64   ;;  %s338_s26 = sand.u32 1, %s4628_s10  }
  0x38   : > { %s3931_s24 = sshll.u32 %s341_s27, 7  ;;  %851 = vst.msk [vmem:[#allocation4 + $0x8] sm:$0x1] %vm850_vm4, %v4642_v21  ;;  %853 = vst.msk [vmem:[#allocation4 + $0x51] sm:$0x1] %vm850_vm4, %v4642_v21  ;;  %s339_s29 = scalar_lea.vmem [#allocation10], %s338_s26 }
  0x39   : > { %s4784_s21 = scalar_lea.vmem %s5542_s0, %s3931_s24  ;;  %4025 = vmatprep.subr.bf16.mxu0 %v526_v5  ;;  %s3928_s24 = sshll.u32 %s4717_s13, 4 }
  0x3a   : > { %v4300_v4 = vld [vmem:[%s4784_s21] sm:$0xff]   ;;  %v4301_v6 = vld [vmem:[%s4784_s21 + $0x8] sm:$0xff]   ;;  %4026 = vmatpush3.bf16.msra.mxu0 %v526_v5  ;;  %v4302_v7 = vld [vmem:[%s4784_s21 + $0x10] sm:$0xff]   ;;  %4062 = vmatpush3.bf16.msra.mxu1 %v4317_v23  ;;  %s3588_s23 = sshll.u32 %s339_s29, 4  ;;  %s5500_s16 = scalar_lea.hbm %s5551_s9, %s3928_s24  ;;  %s5502_s23 = int_to_ptr.vmem [resolvable:$true] %s3588_s23 }
  0x3b   : > { %4027 = vmatprep.mubr.msk.bf16.mxu0 %vm472_vm2, %v4300_v4  ;;  %v4303_v8 = vld [vmem:[%s4784_s21 + $0x18] sm:$0xff]   ;;  %v4304_v9 = vld [vmem:[%s4784_s21 + $0x20] sm:$0xff]   ;;  %v4305_v10 = vld [vmem:[%s4784_s21 + $0x28] sm:$0xff]   ;;  %4071 = vmatprep.subr.bf16.mxu1 %v4832_v24  ;;  %s3576_s17 = scalar_lea.sflag [#allocation9], %s338_s26  ;;  %s4570_s22 = scalar_lea.vmem %s5502_s23, 16 }
  0x3c   : > { %v4306_v11 = vld [vmem:[%s4784_s21 + $0x30] sm:$0xff]   ;;  %v4307_v12 = vld [vmem:[%s4784_s21 + $0x38] sm:$0xff]   ;;  %v4308_v13 = vld [vmem:[%s4784_s21 + $0x40] sm:$0xff]   ;;  %p4571_p6 = scmp.ne.s32.totalorder %s5502_s23, %s4570_s22  ;;  %p5600_p9 = scmp.ne.s32.totalorder %s5556_s19, 0 }
  0x3d   : > { %4028 = vmatmul.mubr.msk.bf16.vlgmr.msra.gmra.mrb[0].mxu0 %vm472_vm2, %v4301_v6  ;;  %v4309_v14 = vld [vmem:[%s4784_s21 + $0x48] sm:$0xff]   ;;  %v4310_v15 = vld [vmem:[%s4784_s21 + $0x50] sm:$0xff]   ;;  %v4311_v16 = vld [vmem:[%s4784_s21 + $0x58] sm:$0xff]   ;;  %s4645_s13 = smov [#allocation10]  }
  0x3e   : > { %4031 = vmatprep.mubr.msk.bf16.mxu0 %vm472_vm2, %v4302_v7  ;;  %v4312_v17 = vld [vmem:[%s4784_s21 + $0x60] sm:$0xff]   ;;  %v4313_v18 = vld [vmem:[%s4784_s21 + $0x68] sm:$0xff]   ;;  %v4314_v19 = vld [vmem:[%s4784_s21 + $0x70] sm:$0xff]   ;;  %p4572_p10 = pnand %p4571_p6, %p5600_p9  ;;  %s4574_s25 = sshll.u32 %s4645_s13, 4  ;;  %s4575_s25 = int_to_ptr.vmem [resolvable:$false] %s4574_s25 }
  0x3f   : > { %v4315_v20 = vld [vmem:[%s4784_s21 + $0x78] sm:$0xff]   ;;  %p4577_p2 = scmp.lt.s32.totalorder %s5502_s23, %s4575_s25 }
  0x40   : > { %p4573_p12 = pneg %p4572_p10 }
  0x45   : > { %4032 = vmatmul.mubr.msk.bf16.gmra.mrb[4].mxu0 %vm472_vm2, %v4303_v8 }
  0x46   : > { %4035 = vmatprep.mubr.msk.bf16.mxu0 %vm472_vm2, %v4304_v9 }
  0x4d   : > { %4036 = vmatmul.mubr.msk.bf16.gmra.mrb[8].mxu0 %vm472_vm2, %v4305_v10 }
  0x4e   : > { %4039 = vmatprep.mubr.msk.bf16.mxu0 %vm472_vm2, %v4306_v11 }
  0x55   : > { %4040 = vmatmul.mubr.msk.bf16.gmra.mrb[12].mxu0 %vm472_vm2, %v4307_v12 }
  0x56   : > { %4043 = vmatprep.mubr.msk.bf16.mxu0 %vm472_vm2, %v4308_v13 }
  0x5d   : > { %4044 = vmatmul.mubr.msk.bf16.gmra.mrb[16].mxu0 %vm472_vm2, %v4309_v14 }
  0x5e   : > { %4047 = vmatprep.mubr.msk.bf16.mxu0 %vm472_vm2, %v4310_v15 }
  0x65   : > { %4048 = vmatmul.mubr.msk.bf16.gmra.mrb[20].mxu0 %vm472_vm2, %v4311_v16 }
  0x66   : > { %4051 = vmatprep.mubr.msk.bf16.mxu0 %vm472_vm2, %v4312_v17 }
  0x6d   : > { %4052 = vmatmul.mubr.msk.bf16.gmra.mrb[24].mxu0 %vm472_vm2, %v4313_v18 }
  0x6e   : > { %4055 = vmatprep.mubr.msk.bf16.mxu0 %vm472_vm2, %v4314_v19 }
  0x75   : > { %4056 = vmatmul.mubr.msk.bf16.gmra.mrb[28].mxu0 %vm472_vm2, %v4315_v20 }
 0x110   : > { %v4029_v26 = vpop.f32.mrb[0].mxu0 }
 0x111   : > { %v571_v27 = vadd.f32 %v4029_v26, %v4838_v25  ;;  %v562_v28 = vpop.f32.mrb[1].mxu0 }
 0x112   : > { %v563_v29 = vadd.f32 %v4838_v25, %v562_v28  ;;  %v4030_v30 = vpop.f32.mrb[2].mxu0 }
 0x113   : > { %v691_v31 = vmax.f32 %v571_v27, 0.0  ;;  %v574_v32 = vadd.f32 %v4030_v30, %v4838_v25  ;;  %v565_v33 = vpop.f32.mrb[3].mxu0 }
 0x114   : > { %v689_v34 = vmax.f32 %v563_v29, 0.0  ;;  %v566_v35 = vadd.f32 %v4838_v25, %v565_v33 }
 0x115   : > { %724 = vst.msk [vmem:[#allocation2 + $0x10] sm:$0xff] %vm721_vm3, %v691_v31  ;;  %v692_v36 = vmax.f32 %v574_v32, 0.0 }
 0x116   : > { %722 = vst.msk [vmem:[#allocation2] sm:$0xff] %vm721_vm3, %v689_v34  ;;  %v690_v37 = vmax.f32 %v566_v35, 0.0 }
 0x117   : > { %725 = vst.msk [vmem:[#allocation2 + $0x18] sm:$0xff] %vm721_vm3, %v692_v36 }
 0x118   : > { %723 = vst.msk [vmem:[#allocation2 + $0x8] sm:$0xff] %vm721_vm3, %v690_v37  ;;  %v4033_v38 = vpop.f32.mrb[4].mxu0  ;;  %v1039_v37 = vld [vmem:[#allocation4 + $0x1] sm:$0xff] }
 0x119   : > { %v587_v39 = vadd.f32 %v4033_v38, %v4838_v25  ;;  %v578_v40 = vpop.f32.mrb[5].mxu0 }
 0x11a   : > { %v579_v41 = vadd.f32 %v4838_v25, %v578_v40  ;;  %v4034_v42 = vpop.f32.mrb[6].mxu0 }
 0x11b   : > { %v695_v43 = vmax.f32 %v587_v39, 0.0  ;;  %v590_v44 = vadd.f32 %v4034_v42, %v4838_v25  ;;  %v581_v45 = vpop.f32.mrb[7].mxu0 }
 0x11c   : > { %v693_v46 = vmax.f32 %v579_v41, 0.0  ;;  %v582_v47 = vadd.f32 %v4838_v25, %v581_v45 }
 0x11d   : > { %728 = vst.msk [vmem:[#allocation2 + $0x30] sm:$0xff] %vm721_vm3, %v695_v43  ;;  %v696_v48 = vmax.f32 %v590_v44, 0.0 }
 0x11e   : > { %v756_v49 = vld [vmem:[#allocation2 + $0x10] ss:$2 sm:$0xff]  ;;  %v788_v50 = vld [vmem:[#allocation2 + $0x11] ss:$2 sm:$0xff]  ;;  %726 = vst.msk [vmem:[#allocation2 + $0x20] sm:$0xff] %vm721_vm3, %v693_v46  ;;  %v694_v51 = vmax.f32 %v582_v47, 0.0 }
 0x11f   : > { %v818_v52 = vmax.f32 %v756_v49, %v788_v50  ;;  %v754_v53 = vld [vmem:[#allocation2] ss:$2 sm:$0xff]  ;;  %v786_v54 = vld [vmem:[#allocation2 + $0x1] ss:$2 sm:$0xff]  ;;  %729 = vst.msk [vmem:[#allocation2 + $0x38] sm:$0xff] %vm721_vm3, %v696_v48  ;;  %v886_v50 = vlaneseq }
 0x120   : > { %v817_v55 = vmax.f32 %v754_v53, %v786_v54  ;;  %727 = vst.msk [vmem:[#allocation2 + $0x28] sm:$0xff] %vm721_vm3, %v694_v51  ;;  %v4037_v56 = vpop.f32.mrb[8].mxu0 }
 0x121   : > { %834 = vst.msk [vmem:[#allocation3 + $0x8] sm:$0xff] %vm721_vm3, %v818_v52  ;;  %v603_v57 = vadd.f32 %v4037_v56, %v4838_v25  ;;  %v594_v58 = vpop.f32.mrb[9].mxu0 }
 0x122   : > { %833 = vst.msk [vmem:[#allocation3] sm:$0xff] %vm721_vm3, %v817_v55  ;;  %v595_v59 = vadd.f32 %v4838_v25, %v594_v58  ;;  %v4038_v60 = vpop.f32.mrb[10].mxu0 }
 0x123   : > { %v699_v61 = vmax.f32 %v603_v57, 0.0  ;;  %v606_v62 = vadd.f32 %v4038_v60, %v4838_v25  ;;  %v597_v63 = vpop.f32.mrb[11].mxu0 }
 0x124   : > { %v697_v0 = vmax.f32 %v595_v59, 0.0  ;;  %v598_v1 = vadd.f32 %v4838_v25, %v597_v63  ;;  %v4895_v63 = vshrl.u32 %v886_v50, 7 }
 0x125   : > { %732 = vst.msk [vmem:[#allocation2 + $0x50] sm:$0xff] %vm721_vm3, %v699_v61  ;;  %v700_v2 = vmax.f32 %v606_v62, 0.0 }
 0x126   : > { %v760_v3 = vld [vmem:[#allocation2 + $0x30] ss:$2 sm:$0xff]  ;;  %v792_v4 = vld [vmem:[#allocation2 + $0x31] ss:$2 sm:$0xff]  ;;  %730 = vst.msk [vmem:[#allocation2 + $0x40] sm:$0xff] %vm721_vm3, %v697_v0  ;;  %v698_v5 = vmax.f32 %v598_v1, 0.0 }
 0x127   : > { %v820_v6 = vmax.f32 %v760_v3, %v792_v4  ;;  %v758_v7 = vld [vmem:[#allocation2 + $0x20] ss:$2 sm:$0xff]  ;;  %v790_v8 = vld [vmem:[#allocation2 + $0x21] ss:$2 sm:$0xff]  ;;  %733 = vst.msk [vmem:[#allocation2 + $0x58] sm:$0xff] %vm721_vm3, %v700_v2 }
 0x128   : > { %v819_v9 = vmax.f32 %v758_v7, %v790_v8  ;;  %731 = vst.msk [vmem:[#allocation2 + $0x48] sm:$0xff] %vm721_vm3, %v698_v5  ;;  %v4041_v10 = vpop.f32.mrb[12].mxu0  ;;  %v855_v11 = vld [vmem:[#allocation3 + $0x8] sm:$0xff] }
 0x129   : > { %836 = vst.msk [vmem:[#allocation3 + $0x18] sm:$0xff] %vm721_vm3, %v820_v6  ;;  %v619_v12 = vadd.f32 %v4041_v10, %v4838_v25  ;;  %v610_v13 = vpop.f32.mrb[13].mxu0  ;;  %v854_v14 = vld [vmem:[#allocation3] sm:$0xff]  ;;  %v4906_v10 = vadd.s32 8, %v4895_v63 }
 0x12a   : > { %835 = vst.msk [vmem:[#allocation3 + $0x10] sm:$0xff] %vm721_vm3, %v819_v9  ;;  %v611_v15 = vadd.f32 %v4838_v25, %v610_v13  ;;  %v4042_v16 = vpop.f32.mrb[14].mxu0  ;;  %v856_v17 = vmax.f32 %v854_v14, %v855_v11 }
 0x12b   : > { %v703_v18 = vmax.f32 %v619_v12, 0.0  ;;  %v622_v19 = vadd.f32 %v4042_v16, %v4838_v25  ;;  %v613_v20 = vpop.f32.mrb[15].mxu0 }
 0x12c   : > { %v701_v21 = vmax.f32 %v611_v15, 0.0  ;;  %v614_v22 = vadd.f32 %v4838_v25, %v613_v20  ;;  %857 = vst.msk [vmem:[#allocation4 + $0x9] sm:$0xff] %vm721_vm3, %v856_v17 }
 0x12d   : > { %736 = vst.msk [vmem:[#allocation2 + $0x70] sm:$0xff] %vm721_vm3, %v703_v18  ;;  %v704_v23 = vmax.f32 %v622_v19, 0.0 }
 0x12e   : > { %v764_v26 = vld [vmem:[#allocation2 + $0x50] ss:$2 sm:$0xff]  ;;  %v796_v27 = vld [vmem:[#allocation2 + $0x51] ss:$2 sm:$0xff]  ;;  %734 = vst.msk [vmem:[#allocation2 + $0x60] sm:$0xff] %vm721_vm3, %v701_v21  ;;  %v702_v28 = vmax.f32 %v614_v22, 0.0 }
 0x12f   : > { %v822_v29 = vmax.f32 %v764_v26, %v796_v27  ;;  %v762_v30 = vld [vmem:[#allocation2 + $0x40] ss:$2 sm:$0xff]  ;;  %v794_v31 = vld [vmem:[#allocation2 + $0x41] ss:$2 sm:$0xff]  ;;  %737 = vst.msk [vmem:[#allocation2 + $0x78] sm:$0xff] %vm721_vm3, %v704_v23  ;;  %v899_v26 = vand.u32 7, %v4895_v63 }
 0x130   : > { %v821_v32 = vmax.f32 %v762_v30, %v794_v31  ;;  %735 = vst.msk [vmem:[#allocation2 + $0x68] sm:$0xff] %vm721_vm3, %v702_v28  ;;  %v4045_v33 = vpop.f32.mrb[16].mxu0  ;;  %v859_v34 = vld [vmem:[#allocation3 + $0x18] sm:$0xff]  ;;  %v906_v27 = vand.u32 7, %v4906_v10 }
 0x131   : > { %838 = vst.msk [vmem:[#allocation3 + $0x28] sm:$0xff] %vm721_vm3, %v822_v29  ;;  %v635_v35 = vadd.f32 %v4045_v33, %v4838_v25  ;;  %v626_v36 = vpop.f32.mrb[17].mxu0  ;;  %v858_v38 = vld [vmem:[#allocation3 + $0x10] sm:$0xff]  ;;  %vm4936_vm5 = vcmp.ge.s32.totalorder %v899_v26, 1  ;;  %vm4946_vm7 = vcmp.le.s32.totalorder %v899_v26, 6 }
 0x132   : > { %837 = vst.msk [vmem:[#allocation3 + $0x20] sm:$0xff] %vm721_vm3, %v821_v32  ;;  %v627_v39 = vadd.f32 %v4838_v25, %v626_v36  ;;  %v4046_v40 = vpop.f32.mrb[18].mxu0  ;;  %v860_v41 = vmax.f32 %v858_v38, %v859_v34  ;;  %v4319_v38 = vld [vmem:[%s5545_s3 + $0x8] sm:$0xff]   ;;  %vm4942_vm6 = vcmp.ge.s32.totalorder %v906_v27, 1  ;;  %vm5004_vm9 = vcmp.le.s32.totalorder %v906_v27, 6 }
 0x133   : > { %v707_v42 = vmax.f32 %v635_v35, 0.0  ;;  %v638_v43 = vadd.f32 %v4046_v40, %v4838_v25  ;;  %v629_v44 = vpop.f32.mrb[19].mxu0  ;;  %v4882_v45 = vld [vmem:[#allocation4 + $0x9] sm:$0xff] }
 0x134   : > { %v705_v46 = vmax.f32 %v627_v39, 0.0  ;;  %v630_v47 = vadd.f32 %v4838_v25, %v629_v44  ;;  %v1047_v48 = vpack.c.bf16 %v4882_v45, %v1039_v37  ;;  %861 = vst.msk [vmem:[#allocation4 + $0x11] sm:$0xff] %vm721_vm3, %v860_v41 }
 0x135   : > { %740 = vst.msk [vmem:[#allocation2 + $0x90] sm:$0xff] %vm721_vm3, %v707_v42  ;;  %v708_v49 = vmax.f32 %v638_v43, 0.0 }
 0x136   : > { %v768_v51 = vld [vmem:[#allocation2 + $0x70] ss:$2 sm:$0xff]  ;;  %v800_v52 = vld [vmem:[#allocation2 + $0x71] ss:$2 sm:$0xff]  ;;  %738 = vst.msk [vmem:[#allocation2 + $0x80] sm:$0xff] %vm721_vm3, %v705_v46  ;;  %v706_v53 = vmax.f32 %v630_v47, 0.0  ;;  %4063 = vmatprep.mubr.msk.bf16.mxu1 %vm721_vm3, %v1047_v48 }
 0x137   : > { %v824_v54 = vmax.f32 %v768_v51, %v800_v52  ;;  %v766_v55 = vld [vmem:[#allocation2 + $0x60] ss:$2 sm:$0xff]  ;;  %v798_v56 = vld [vmem:[#allocation2 + $0x61] ss:$2 sm:$0xff]  ;;  %741 = vst.msk [vmem:[#allocation2 + $0x98] sm:$0xff] %vm721_vm3, %v708_v49  ;;  %v4956_v51 = vadd.s32 16, %v4895_v63 }
 0x138   : > { %v823_v57 = vmax.f32 %v766_v55, %v798_v56  ;;  %739 = vst.msk [vmem:[#allocation2 + $0x88] sm:$0xff] %vm721_vm3, %v706_v53  ;;  %v4049_v58 = vpop.f32.mrb[20].mxu0  ;;  %v863_v59 = vld [vmem:[#allocation3 + $0x28] sm:$0xff] }
 0x139   : > { %840 = vst.msk [vmem:[#allocation3 + $0x38] sm:$0xff] %vm721_vm3, %v824_v54  ;;  %v651_v60 = vadd.f32 %v4049_v58, %v4838_v25  ;;  %v642_v61 = vpop.f32.mrb[21].mxu0  ;;  %v862_v62 = vld [vmem:[#allocation3 + $0x20] sm:$0xff] }
 0x13a   : > { %839 = vst.msk [vmem:[#allocation3 + $0x30] sm:$0xff] %vm721_vm3, %v823_v57  ;;  %v643_v0 = vadd.f32 %v4838_v25, %v642_v61  ;;  %v4050_v1 = vpop.f32.mrb[22].mxu0  ;;  %v864_v2 = vmax.f32 %v862_v62, %v863_v59 }
 0x13b   : > { %v711_v3 = vmax.f32 %v651_v60, 0.0  ;;  %v654_v4 = vadd.f32 %v4050_v1, %v4838_v25  ;;  %v645_v5 = vpop.f32.mrb[23].mxu0  ;;  %v4900_v6 = vld [vmem:[#allocation4 + $0x11] sm:$0xff]  ;;  %v4970_v60 = vld [vmem:[%s5545_s3 + $0x20] sm:$0xff]  }
 0x13c   : > { %v709_v7 = vmax.f32 %v643_v0, 0.0  ;;  %v646_v8 = vadd.f32 %v4838_v25, %v645_v5  ;;  %865 = vst.msk [vmem:[#allocation4 + $0x19] sm:$0xff] %vm721_vm3, %v864_v2  ;;  %v1510_v11 = vpack.c.bf16 %v4900_v6, %v4882_v45  ;;  %v4931_v39 = vld [vmem:[#allocation4 + $0x10] sm:$0xff]  ;;  %v913_v5 = vand.u32 7, %v4956_v51  ;;  %v4328_v45 = vld [vmem:[%s5545_s3 + $0x60] sm:$0xff]  }
 0x13d   : > { %744 = vst.msk [vmem:[#allocation2 + $0xb0] sm:$0xff] %vm721_vm3, %v711_v3  ;;  %v712_v9 = vmax.f32 %v654_v4, 0.0  ;;  %v1746_v55 = vsel %vm4936_vm5, %v4931_v39, 0.0  ;;  %v891_v51 = vadd.s32 32, %v4895_v63 }
 0x13e   : > { %v772_v12 = vld [vmem:[#allocation2 + $0x90] ss:$2 sm:$0xff]  ;;  %v804_v13 = vld [vmem:[#allocation2 + $0x91] ss:$2 sm:$0xff]  ;;  %742 = vst.msk [vmem:[#allocation2 + $0xa0] sm:$0xff] %vm721_vm3, %v709_v7  ;;  %v710_v14 = vmax.f32 %v646_v8, 0.0 }
 0x13f   : > { %v826_v15 = vmax.f32 %v772_v12, %v804_v13  ;;  %v770_v16 = vld [vmem:[#allocation2 + $0x80] ss:$2 sm:$0xff]  ;;  %v802_v17 = vld [vmem:[#allocation2 + $0x81] ss:$2 sm:$0xff]  ;;  %745 = vst.msk [vmem:[#allocation2 + $0xb8] sm:$0xff] %vm721_vm3, %v712_v9  ;;  %vm4997_vm8 = vcmp.ge.s32.totalorder %v913_v5, 1 }
 0x140   : > { %v825_v18 = vmax.f32 %v770_v16, %v802_v17  ;;  %743 = vst.msk [vmem:[#allocation2 + $0xa8] sm:$0xff] %vm721_vm3, %v710_v14  ;;  %v4053_v19 = vpop.f32.mrb[24].mxu0  ;;  %v867_v20 = vld [vmem:[#allocation3 + $0x38] sm:$0xff]  ;;  %vm5035_vm11 = vcmp.le.s32.totalorder %v913_v5, 6 }
 0x141   : > { %842 = vst.msk [vmem:[#allocation3 + $0x48] sm:$0xff] %vm721_vm3, %v826_v15  ;;  %v667_v21 = vadd.f32 %v4053_v19, %v4838_v25  ;;  %v658_v22 = vpop.f32.mrb[25].mxu0  ;;  %v866_v23 = vld [vmem:[#allocation3 + $0x30] sm:$0xff]  ;;  %v890_v15 = vadd.s32 24, %v4895_v63 }
 0x142   : > { %841 = vst.msk [vmem:[#allocation3 + $0x40] sm:$0xff] %vm721_vm3, %v825_v18  ;;  %v659_v28 = vadd.f32 %v4838_v25, %v658_v22  ;;  %v4054_v29 = vpop.f32.mrb[26].mxu0  ;;  %v868_v30 = vmax.f32 %v866_v23, %v867_v20 }
 0x143   : > { %v715_v31 = vmax.f32 %v667_v21, 0.0  ;;  %v670_v32 = vadd.f32 %v4054_v29, %v4838_v25  ;;  %v661_v33 = vpop.f32.mrb[27].mxu0  ;;  %v4920_v34 = vld [vmem:[#allocation4 + $0x19] sm:$0xff] }
 0x144   : > { %v713_v35 = vmax.f32 %v659_v28, 0.0  ;;  %v662_v36 = vadd.f32 %v4838_v25, %v661_v33  ;;  %v4925_v37 = vpack.c.bf16 %v4920_v34, %v4900_v6  ;;  %869 = vst.msk [vmem:[#allocation4 + $0x21] sm:$0xff] %vm721_vm3, %v868_v30  ;;  %v4933_v40 = vld [vmem:[#allocation4 + $0x18] sm:$0xff]  ;;  %v920_v33 = vand.u32 7, %v890_v15  ;;  %v991_v15 = vld [vmem:[#allocation4] sm:$0xff] }
 0x145   : > { %748 = vst.msk [vmem:[#allocation2 + $0xd0] sm:$0xff] %vm721_vm3, %v715_v31  ;;  %v716_v41 = vmax.f32 %v670_v32, 0.0  ;;  %v4950_v46 = vld [vmem:[#allocation4 + $0x12] sm:$0xff]  ;;  %v1747_v56 = vsel %vm4942_vm6, %v4933_v40, 0.0 }
 0x146   : > { %v776_v47 = vld [vmem:[#allocation2 + $0xb0] ss:$2 sm:$0xff]  ;;  %v808_v48 = vld [vmem:[#allocation2 + $0xb1] ss:$2 sm:$0xff]  ;;  %746 = vst.msk [vmem:[#allocation2 + $0xc0] sm:$0xff] %vm721_vm3, %v713_v35  ;;  %v714_v49 = vmax.f32 %v662_v36, 0.0  ;;  %4064 = vmatmul.mubr.msk.bf16.vlgmr.msra.gmra.mrb[0].mxu1 %vm721_vm3, %v4925_v37 }
 0x147   : > { %v828_v52 = vmax.f32 %v776_v47, %v808_v48  ;;  %v774_v53 = vld [vmem:[#allocation2 + $0xa0] ss:$2 sm:$0xff]  ;;  %v806_v54 = vld [vmem:[#allocation2 + $0xa1] ss:$2 sm:$0xff]  ;;  %749 = vst.msk [vmem:[#allocation2 + $0xd8] sm:$0xff] %vm721_vm3, %v716_v41  ;;  %4072 = vmatpush3.bf16.msra.mxu1 %v4832_v24  ;;  %v4972_v24 = vpack.c.bf16 %v1747_v56, %v1746_v55  ;;  %v1982_v61 = vsel %vm4946_vm7, %v4950_v46, 0.0 }
 0x148   : > { %v827_v57 = vmax.f32 %v774_v53, %v806_v54  ;;  %747 = vst.msk [vmem:[#allocation2 + $0xc8] sm:$0xff] %vm721_vm3, %v714_v49  ;;  %v4057_v58 = vpop.f32.mrb[28].mxu0  ;;  %v871_v59 = vld [vmem:[#allocation3 + $0x48] sm:$0xff]  ;;  %4073 = vmatprep.subr.bf16.mxu1 %v4319_v38  ;;  %vm5030_vm10 = vcmp.ge.s32.totalorder %v920_v33, 1  ;;  %vm5061_vm13 = vcmp.le.s32.totalorder %v920_v33, 6  ;;  %v4327_v49 = vld [vmem:[%s5545_s3 + $0x58] sm:$0xff]  }
 0x149   : > { %844 = vst.msk [vmem:[#allocation3 + $0x58] sm:$0xff] %vm721_vm3, %v828_v52  ;;  %v683_v62 = vadd.f32 %v4057_v58, %v4838_v25  ;;  %v674_v0 = vpop.f32.mrb[29].mxu0  ;;  %v870_v1 = vld [vmem:[#allocation3 + $0x40] sm:$0xff]  ;;  %v5575_v52 = vmov 0 }
 0x14a   : > { %843 = vst.msk [vmem:[#allocation3 + $0x50] sm:$0xff] %vm721_vm3, %v827_v57  ;;  %v675_v2 = vadd.f32 %v4838_v25, %v674_v0  ;;  %v4058_v3 = vpop.f32.mrb[30].mxu0  ;;  %v872_v4 = vmax.f32 %v870_v1, %v871_v59  ;;  %v5576_v52 = vsel %vm5035_vm11, 4294967295, %v5575_v52  ;;  %v927_v1 = vand.u32 7, %v891_v51 }
 0x14b   : > { %v719_v7 = vmax.f32 %v683_v62, 0.0  ;;  %v686_v8 = vadd.f32 %v4058_v3, %v4838_v25  ;;  %v677_v9 = vpop.f32.mrb[31].mxu0  ;;  %v4983_v12 = vld [vmem:[#allocation4 + $0x21] sm:$0xff]  ;;  %4074 = vmatpush3.bf16.msra.mxu1 %v4319_v38  ;;  %v893_v51 = vadd.s32 48, %v4895_v63 }
 0x14c   : > { %v717_v13 = vmax.f32 %v675_v2, 0.0  ;;  %v678_v14 = vadd.f32 %v4838_v25, %v677_v9  ;;  %873 = vst.msk [vmem:[#allocation4 + $0x29] sm:$0xff] %vm721_vm3, %v872_v4  ;;  %4083 = vmatprep.subr.bf16.mxu1 %v4970_v60  ;;  %v4989_v16 = vld [vmem:[#allocation4 + $0x20] sm:$0xff]  ;;  %v1511_v19 = vpack.c.bf16 %v4983_v12, %v4920_v34  ;;  %vm5057_vm12 = vcmp.ge.s32.totalorder %v927_v1, 1 }
 0x14d   : > { %752 = vst.msk [vmem:[#allocation2 + $0xf0] sm:$0xff] %vm721_vm3, %v719_v7  ;;  %v720_v17 = vmax.f32 %v686_v8, 0.0  ;;  %v4992_v18 = vld [vmem:[#allocation4 + $0x1a] sm:$0xff]  ;;  %v1748_v30 = vsel %vm4997_vm8, %v4989_v16, 0.0  ;;  %v892_v7 = vadd.s32 40, %v4895_v63  ;;  %vm5097_vm15 = vcmp.le.s32.totalorder %v927_v1, 6 }
 0x14e   : > { %v780_v20 = vld [vmem:[#allocation2 + $0xd0] ss:$2 sm:$0xff]  ;;  %v812_v21 = vld [vmem:[#allocation2 + $0xd1] ss:$2 sm:$0xff]  ;;  %750 = vst.msk [vmem:[#allocation2 + $0xe0] sm:$0xff] %vm721_vm3, %v717_v13  ;;  %v718_v25 = vmax.f32 %v678_v14, 0.0 }
 0x14f   : > { %v830_v23 = vmax.f32 %v780_v20, %v812_v21  ;;  %v778_v26 = vld [vmem:[#allocation2 + $0xc0] ss:$2 sm:$0xff]  ;;  %v810_v28 = vld [vmem:[#allocation2 + $0xc1] ss:$2 sm:$0xff]  ;;  %753 = vst.msk [vmem:[#allocation2 + $0xf8] sm:$0xff] %vm721_vm3, %v720_v17  ;;  %v1983_v35 = vsel %vm5004_vm9, %v4992_v18, 0.0 }
 0x150   : > { %v829_v31 = vmax.f32 %v778_v26, %v810_v28  ;;  %751 = vst.msk [vmem:[#allocation2 + $0xe8] sm:$0xff] %vm721_vm3, %v718_v25  ;;  %v875_v32 = vld [vmem:[#allocation3 + $0x58] sm:$0xff]  ;;  %v5016_v27 = vpack.c.bf16 %v1983_v35, %v1982_v61  ;;  %v5071_v17 = vld [vmem:[#allocation4 + $0x8] sm:$0xff]  ;;  %v934_v21 = vand.u32 7, %v892_v7  ;;  %v1023_v28 = vsel %vm4936_vm5, %v991_v15, 0.0 }
 0x151   : > { %846 = vst.msk [vmem:[#allocation3 + $0x68] sm:$0xff] %vm721_vm3, %v830_v23  ;;  %v874_v10 = vld [vmem:[#allocation3 + $0x50] sm:$0xff]  ;;  %v4321_v15 = vld [vmem:[%s5545_s3 + $0x28] sm:$0xff]  }
 0x152   : > { %845 = vst.msk [vmem:[#allocation3 + $0x60] sm:$0xff] %vm721_vm3, %v829_v31  ;;  %v876_v36 = vmax.f32 %v874_v10, %v875_v32  ;;  %vm5092_vm14 = vcmp.ge.s32.totalorder %v934_v21, 1  ;;  %vm5141_vm2 = vcmp.le.s32.totalorder %v934_v21, 6  ;;  %v5156_v21 = vld [vmem:[#allocation4 + $0xa] sm:$0xff] }
 0x153   : > { %v5019_v38 = vld [vmem:[#allocation4 + $0x29] sm:$0xff]  ;;  %v1624_v34 = vsel %vm4946_vm7, %v5156_v21, 0.0 }
 0x154   : > { %v5021_v41 = vld [vmem:[#allocation4 + $0x28] sm:$0xff]  ;;  %v5027_v48 = vpack.c.bf16 %v5019_v38, %v4983_v12  ;;  %877 = vst.msk [vmem:[#allocation4 + $0x31] sm:$0xff] %vm721_vm3, %v876_v36 }
 0x155   : > { %v5023_v47 = vld [vmem:[#allocation4 + $0x22] sm:$0xff]  ;;  %v1749_v53 = vsel %vm5030_vm10, %v5021_v41, 0.0  ;;  %v1028_v1 = vsel %vm5092_vm14, %v5021_v41, 0.0 }
 0x156   : > { %v1984_v54 = vsel %vm5035_vm11, %v5023_v47, 0.0  ;;  %v784_v55 = vld [vmem:[#allocation2 + $0xf0] ss:$2 sm:$0xff]  ;;  %v816_v56 = vld [vmem:[#allocation2 + $0xf1] ss:$2 sm:$0xff]  ;;  %4067 = vmatprep.mubr.msk.bf16.mxu1 %vm721_vm3, %v5027_v48  ;;  %v5047_v57 = vpack.c.bf16 %v1749_v53, %v1748_v30  ;;  %v1024_v30 = vsel %vm4942_vm6, %v5071_v17, 0.0 }
 0x157   : > { %v832_v58 = vmax.f32 %v784_v55, %v816_v56  ;;  %v782_v59 = vld [vmem:[#allocation2 + $0xe0] ss:$2 sm:$0xff]  ;;  %v814_v61 = vld [vmem:[#allocation2 + $0xe1] ss:$2 sm:$0xff]  ;;  %v894_v55 = vadd.s32 56, %v4895_v63 }
 0x158   : > { %v831_v62 = vmax.f32 %v782_v59, %v814_v61  ;;  %v879_v0 = vld [vmem:[#allocation3 + $0x68] sm:$0xff]  ;;  %v941_v61 = vand.u32 7, %v893_v51 }
 0x159   : > { %848 = vst.msk [vmem:[#allocation3 + $0x78] sm:$0xff] %vm721_vm3, %v832_v58  ;;  %v878_v2 = vld [vmem:[#allocation3 + $0x60] sm:$0xff] }
 0x15a   : > { %847 = vst.msk [vmem:[#allocation3 + $0x70] sm:$0xff] %vm721_vm3, %v831_v62  ;;  %v880_v3 = vmax.f32 %v878_v2, %v879_v0  ;;  %v1026_v62 = vsel %vm5030_vm10, %v4933_v40, 0.0  ;;  %v948_v0 = vand.u32 7, %v894_v55  ;;  %v1025_v2 = vsel %vm4997_vm8, %v4931_v39, 0.0 }
 0x15b   : > { %v5051_v4 = vld [vmem:[#allocation4 + $0x30] sm:$0xff]  ;;  %vm5133_vm0 = vcmp.ge.s32.totalorder %v941_v61, 1 }
 0x15c   : > { %v5053_v5 = vld [vmem:[#allocation4 + $0x2a] sm:$0xff]  ;;  %881 = vst.msk [vmem:[#allocation4 + $0x39] sm:$0xff] %vm721_vm3, %v880_v3  ;;  %v1750_v13 = vsel %vm5057_vm12, %v5051_v4, 0.0  ;;  %vm5137_vm1 = vcmp.ge.s32.totalorder %v948_v0, 1  ;;  %vm5194_vm4 = vcmp.le.s32.totalorder %v948_v0, 6  ;;  %v1389_v0 = vsel %vm4942_vm6, %v4931_v39, 0.0 }
 0x15d   : > { %v1985_v14 = vsel %vm5061_vm13, %v5053_v5, 0.0  ;;  %v5075_v26 = vld [vmem:[#allocation4 + $0x31] sm:$0xff]  ;;  %v1391_v39 = vsel %vm5030_vm10, %v4989_v16, 0.0  ;;  %v1393_v43 = vsel %vm5092_vm14, %v5051_v4, 0.0  ;;  %v1628_v8 = vsel %vm5097_vm15, %v5053_v5, 0.0 }
 0x15e   : > { %v5073_v20 = vpack.c.bf16 %v1985_v14, %v1984_v54  ;;  %v1031_v54 = vpack.c.bf16 %v1024_v30, %v1023_v28  ;;  %v1027_v14 = vsel %vm5057_vm12, %v4989_v16, 0.0  ;;  %v4340_v30 = vld [vmem:[#allocation7 + $0x110] ss:$8 sps:$4 sm:$0xff]   ;;  %vm5351_vm6 = vcmp.lt.s32.totalorder %v886_v50, 64 }
 0x15f   : > { %v1033_v28 = vpack.c.bf16 %v1028_v1, %v1027_v14  ;;  %v4322_v1 = vld [vmem:[%s5545_s3 + $0x30] sm:$0xff]   ;;  %v1029_v14 = vsel %vm5133_vm0, %v5051_v4, 0.0  ;;  %v1512_v4 = vpack.c.bf16 %v5075_v26, %v5019_v38 }
 0x160   : > { %v883_v25 = vld [vmem:[#allocation3 + $0x78] sm:$0xff] }
 0x161   : > { %v882_v23 = vld [vmem:[#allocation3 + $0x70] sm:$0xff] }
 0x162   : > { %v884_v31 = vmax.f32 %v882_v23, %v883_v25  ;;  %v4342_v25 = vld [vmem:[#allocation7 + $0x114] ss:$8 sps:$4 sm:$0xff]  }
 0x163   : > { %v5082_v32 = vld [vmem:[#allocation4 + $0x39] sm:$0xff] }
 0x164   : > { %v5084_v33 = vld [vmem:[#allocation4 + $0x38] sm:$0xff]  ;;  %v5090_v10 = vpack.c.bf16 %v5082_v32, %v5075_v26  ;;  %885 = vst.msk [vmem:[#allocation4 + $0x41] sm:$0xff] %vm721_vm3, %v884_v31  ;;  %v4329_v26 = vld [vmem:[%s5545_s3 + $0x68] sm:$0xff]  }
 0x165   : > { %v5086_v35 = vld [vmem:[#allocation4 + $0x32] sm:$0xff]  ;;  %v1751_v56 = vsel %vm5092_vm14, %v5084_v33, 0.0  ;;  %v1394_v22 = vsel %vm5133_vm0, %v5084_v33, 0.0 }
 0x166   : > { %v1986_v58 = vsel %vm5097_vm15, %v5086_v35, 0.0  ;;  %4068 = vmatmul.mubr.msk.bf16.gmra.mrb[4].mxu1 %vm721_vm3, %v5090_v10  ;;  %v5111_v59 = vpack.c.bf16 %v1751_v56, %v1750_v13  ;;  %v1032_v13 = vpack.c.bf16 %v1026_v62, %v1025_v2  ;;  %v1030_v2 = vsel %vm5137_vm1, %v5084_v33, 0.0  ;;  %v4331_v33 = vld [vmem:[%s5545_s3 + $0x78] sm:$0xff]  }
 0x167   : > { %4075 = vmatprep.mubr.msk.bf16.mxu1 %vm721_vm3, %v1031_v54  ;;  %v4343_v31 = vld [vmem:[#allocation7 + $0x10] ss:$8 sps:$4 sm:$0xff]  }
 0x16b   : > { %v5123_v3 = vld [vmem:[#allocation4 + $0x3a] sm:$0xff]  ;;  %v1745_v23 = vld [vmem:[#allocation4 + $0x48] sm:$0xff] }
 0x16c   : > { %v5125_v7 = vld [vmem:[#allocation4 + $0x40] sm:$0xff]  ;;  %v1753_v54 = vsel %vm5137_vm1, %v1745_v23, 0.0  ;;  %v1987_v55 = vsel %vm5141_vm2, %v5123_v3, 0.0 }
 0x16d   : > { %v1752_v51 = vsel %vm5133_vm0, %v5125_v7, 0.0  ;;  %v5160_v62 = vpack.c.bf16 %v1987_v55, %v1986_v58  ;;  %v1034_v58 = vpack.c.bf16 %v1030_v2, %v1029_v14  ;;  %v1270_v2 = vsel %vm5097_vm15, %v5023_v47, 0.0  ;;  %v1509_v6 = vld [vmem:[#allocation4 + $0x41] sm:$0xff]  ;;  %v4357_v14 = vld [vmem:[#allocation7 + $0x34] ss:$8 sps:$4 sm:$0xff]  }
 0x16e   : > { %4076 = vmatmul.mubr.msk.bf16.vlgmr.msra.gmra.mrb[0].mxu1 %vm721_vm3, %v1032_v13  ;;  %v5158_v56 = vpack.c.bf16 %v1753_v54, %v1752_v51  ;;  %v1234_v13 = vld [vmem:[#allocation4 + $0x2] sm:$0xff]  ;;  %v1269_v51 = vsel %vm5061_vm13, %v4992_v18, 0.0  ;;  %v1271_v54 = vsel %vm5141_vm2, %v5053_v5, 0.0  ;;  %v1395_v16 = vsel %vm5137_vm1, %v5125_v7, 0.0 }
 0x16f   : > { %4084 = vmatpush3.bf16.msra.mxu1 %v4970_v60  ;;  %4079 = vmatprep.mubr.msk.bf16.mxu1 %vm721_vm3, %v1033_v28  ;;  %v1267_v60 = vsel %vm5004_vm9, %v5156_v21, 0.0  ;;  %v1266_v23 = vsel %vm4946_vm7, %v1234_v13, 0.0  ;;  %v4323_v13 = vld [vmem:[%s5545_s3 + $0x38] sm:$0xff]   ;;  %v1513_v38 = vpack.c.bf16 %v1509_v6, %v5082_v32  ;;  %v4337_v7 = vld [vmem:[#allocation7] ss:$8 sps:$4 sm:$0xff]   ;;  %vm2165_vm7 = vcmp.ge.s32.totalorder %v886_v50, 64 }
 0x170   : > { %4085 = vmatprep.subr.bf16.mxu1 %v4321_v15  ;;  %v1274_v28 = vpack.c.bf16 %v1267_v60, %v1266_v23  ;;  %v1276_v60 = vpack.c.bf16 %v1271_v54, %v1270_v2  ;;  %v4324_v23 = vld [vmem:[%s5545_s3 + $0x40] sm:$0xff]  }
 0x171   : > { %v4348_v21 = vld [vmem:[#allocation7 + $0x124] ss:$8 sps:$4 sm:$0xff]  }
 0x173   : > { %4086 = vmatpush3.bf16.msra.mxu1 %v4321_v15  ;;  %v1268_v15 = vsel %vm5035_vm11, %v4950_v46, 0.0  ;;  %vm5199_vm11 = vcmp.le.s32.totalorder %v941_v61, 6 }
 0x174   : > { %4095 = vmatprep.subr.bf16.mxu1 %v4322_v1  ;;  %v1275_v55 = vpack.c.bf16 %v1269_v51, %v1268_v15  ;;  %v1388_v51 = vsel %vm4936_vm5, %v5071_v17, 0.0  ;;  %v1390_v15 = vsel %vm4997_vm8, %v4933_v40, 0.0  ;;  %v1392_v17 = vsel %vm5057_vm12, %v5021_v41, 0.0  ;;  %v4326_v40 = vld [vmem:[%s5545_s3 + $0x50] sm:$0xff]  }
 0x175   : > { %v1396_v54 = vpack.c.bf16 %v1389_v0, %v1388_v51  ;;  %v1397_v42 = vpack.c.bf16 %v1391_v39, %v1390_v15  ;;  %v1398_v2 = vpack.c.bf16 %v1393_v43, %v1392_v17  ;;  %v1399_v41 = vpack.c.bf16 %v1395_v16, %v1394_v22  ;;  %v4363_v0 = vld [vmem:[#allocation7 + $0x44] ss:$8 sps:$4 sm:$0xff]   ;;  %v4366_v51 = vld [vmem:[#allocation7 + $0x154] ss:$8 sps:$4 sm:$0xff]   ;;  %v4364_v39 = vld [vmem:[#allocation7 + $0x150] ss:$8 sps:$4 sm:$0xff]  }
 0x176   : > { %4080 = vmatmul.mubr.msk.bf16.gmra.mrb[4].mxu1 %vm721_vm3, %v1034_v58  ;;  %vm5595_vm5 = vnez %v5576_v52  ;;  %v1630_v52 = vsel %vm5199_vm11, %v5123_v3, 0.0  ;;  %v4352_v58 = vld [vmem:[#allocation7 + $0x130] ss:$8 sps:$4 sm:$0xff]   ;;  %v4372_v15 = vld [vmem:[#allocation7 + $0x164] ss:$8 sps:$4 sm:$0xff]   ;;  %vm2166_vm8 = vcmp.lt.s32.totalorder %v886_v50, 128 }
 0x177   : > { %4087 = vmatprep.mubr.msk.bf16.mxu1 %vm721_vm3, %v1274_v28  ;;  %v1273_v28 = vsel %vm5194_vm4, %v5123_v3, 0.0  ;;  %v1626_v29 = vsel %vm5595_vm5, %v4992_v18, 0.0  ;;  %v4330_v18 = vld [vmem:[%s5545_s3 + $0x70] sm:$0xff]   ;;  %v4336_v3 = vld [vmem:[#allocation7 + $0x104] ss:$8 sps:$4 sm:$0xff]  }
 0x178   : > { %3278 = vmatprep.subr.bf16.mxu0 %v4336_v3  ;;  %v4367_v43 = vld [vmem:[#allocation7 + $0x50] ss:$8 sps:$4 sm:$0xff]   ;;  %v4370_v17 = vld [vmem:[#allocation7 + $0x160] ss:$8 sps:$4 sm:$0xff]  }
 0x179   : > { %v4376_v16 = vld [vmem:[#allocation7 + $0x170] ss:$8 sps:$4 sm:$0xff]  }
 0x17a   : > { %v4379_v22 = vld [vmem:[#allocation7 + $0x70] ss:$8 sps:$4 sm:$0xff]  }
 0x17e   : > { %4088 = vmatmul.mubr.msk.bf16.vlgmr.msra.gmra.mrb[0].mxu1 %vm721_vm3, %v1275_v55  ;;  %v4325_v55 = vld [vmem:[%s5545_s3 + $0x48] sm:$0xff]  }
 0x17f   : > { %4096 = vmatpush3.bf16.msra.mxu1 %v4322_v1  ;;  %4091 = vmatprep.mubr.msk.bf16.mxu1 %vm721_vm3, %v1276_v60  ;;  %v1272_v1 = vsel %vm5199_vm11, %v5086_v35, 0.0  ;;  %v4354_v60 = vld [vmem:[#allocation7 + $0x134] ss:$8 sps:$4 sm:$0xff]  }
 0x180   : > { %4097 = vmatprep.subr.bf16.mxu1 %v4323_v13  ;;  %v1277_v61 = vpack.c.bf16 %v1273_v28, %v1272_v1  ;;  %v4360_v28 = vld [vmem:[#allocation7 + $0x144] ss:$8 sps:$4 sm:$0xff]   ;;  %v4358_v1 = vld [vmem:[#allocation7 + $0x140] ss:$8 sps:$4 sm:$0xff]  }
 0x183   : > { %4098 = vmatpush3.bf16.msra.mxu1 %v4323_v13  ;;  %v4349_v13 = vld [vmem:[#allocation7 + $0x20] ss:$8 sps:$4 sm:$0xff]  }
 0x184   : > { %4107 = vmatprep.subr.bf16.mxu1 %v4324_v23 }
 0x186   : > { %4092 = vmatmul.mubr.msk.bf16.gmra.mrb[4].mxu1 %vm721_vm3, %v1277_v61  ;;  %v4361_v61 = vld [vmem:[#allocation7 + $0x40] ss:$8 sps:$4 sm:$0xff]  }
 0x187   : > { %4099 = vmatprep.mubr.msk.bf16.mxu1 %vm721_vm3, %v1396_v54  ;;  %v4369_v54 = vld [vmem:[#allocation7 + $0x54] ss:$8 sps:$4 sm:$0xff]  }
 0x18e   : > { %4100 = vmatmul.mubr.msk.bf16.vlgmr.msra.gmra.mrb[0].mxu1 %vm721_vm3, %v1397_v42  ;;  %v4375_v42 = vld [vmem:[#allocation7 + $0x64] ss:$8 sps:$4 sm:$0xff]  }
 0x18f   : > { %4108 = vmatpush3.bf16.msra.mxu1 %v4324_v23  ;;  %4103 = vmatprep.mubr.msk.bf16.mxu1 %vm721_vm3, %v1398_v2  ;;  %v4355_v23 = vld [vmem:[#allocation7 + $0x30] ss:$8 sps:$4 sm:$0xff]   ;;  %v4378_v2 = vld [vmem:[#allocation7 + $0x174] ss:$8 sps:$4 sm:$0xff]  }
 0x190   : > { %4109 = vmatprep.subr.bf16.mxu1 %v4325_v55 }
 0x193   : > { %4110 = vmatpush3.bf16.msra.mxu1 %v4325_v55  ;;  %v4373_v55 = vld [vmem:[#allocation7 + $0x60] ss:$8 sps:$4 sm:$0xff]  }
 0x194   : > { %4119 = vmatprep.subr.bf16.mxu1 %v4326_v40 }
 0x196   : > { %4104 = vmatmul.mubr.msk.bf16.gmra.mrb[4].mxu1 %vm721_vm3, %v1399_v41  ;;  %v4384_v41 = vld [vmem:[#allocation7 + $0x184] ss:$8 sps:$4 sm:$0xff]  }
 0x197   : > { %4111 = vmatprep.mubr.msk.bf16.mxu1 %vm721_vm3, %v1510_v11  ;;  %v1625_v11 = vsel %vm5004_vm9, %v4950_v46, 0.0  ;;  %v1629_v46 = vsel %vm5141_vm2, %v5086_v35, 0.0  ;;  %v4332_v35 = vld [vmem:[%s5545_s3 + $0x80] sm:$0xff]   ;;  %vm5395_vm9 = vmand %vm2165_vm7, %vm2166_vm8 }
 0x198   : > { %v1632_v12 = vpack.c.bf16 %v1625_v11, %v1624_v34  ;;  %v1634_v32 = vpack.c.bf16 %v1629_v46, %v1628_v8  ;;  %v4393_v11 = vld [vmem:[#allocation7 + $0x94] ss:$8 sps:$4 sm:$0xff]   ;;  %v4391_v34 = vld [vmem:[#allocation7 + $0x90] ss:$8 sps:$4 sm:$0xff]  }
 0x19e   : > { %4112 = vmatmul.mubr.msk.bf16.vlgmr.msra.gmra.mrb[0].mxu1 %vm721_vm3, %v1511_v19  ;;  %v1627_v19 = vsel %vm5061_vm13, %v5023_v47, 0.0  ;;  %v1623_v47 = vld [vmem:[#allocation4 + $0x42] sm:$0xff] }
 0x19f   : > { %4120 = vmatpush3.bf16.msra.mxu1 %v4326_v40  ;;  %4115 = vmatprep.mubr.msk.bf16.mxu1 %vm721_vm3, %v1512_v4  ;;  %v1633_v44 = vpack.c.bf16 %v1627_v19, %v1626_v29  ;;  %v1631_v5 = vsel %vm5194_vm4, %v1623_v47, 0.0  ;;  %v4381_v40 = vld [vmem:[#allocation7 + $0x74] ss:$8 sps:$4 sm:$0xff]   ;;  %v4382_v4 = vld [vmem:[#allocation7 + $0x180] ss:$8 sps:$4 sm:$0xff]  }
 0x1a0   : > { %4121 = vmatprep.subr.bf16.mxu1 %v4327_v49  ;;  %v1635_v9 = vpack.c.bf16 %v1631_v5, %v1630_v52 }
 0x1a3   : > { %4122 = vmatpush3.bf16.msra.mxu1 %v4327_v49  ;;  %v4387_v49 = vld [vmem:[#allocation7 + $0x84] ss:$8 sps:$4 sm:$0xff]  }
 0x1a4   : > { %4131 = vmatprep.subr.bf16.mxu1 %v4328_v45 }
 0x1a6   : > { %4116 = vmatmul.mubr.msk.bf16.gmra.mrb[4].mxu1 %vm721_vm3, %v1513_v38  ;;  %v4388_v38 = vld [vmem:[#allocation7 + $0x190] ss:$8 sps:$4 sm:$0xff]  }
 0x1a7   : > { %4123 = vmatprep.mubr.msk.bf16.mxu1 %vm721_vm3, %v1632_v12  ;;  %v3783_v12 = vld [vmem:[%s5546_s4] ss:$0 sm:$0xff] }
 0x1ae   : > { %4124 = vmatmul.mubr.msk.bf16.vlgmr.msra.gmra.mrb[0].mxu1 %vm721_vm3, %v1633_v44 }
 0x1af   : > { %4132 = vmatpush3.bf16.msra.mxu1 %v4328_v45  ;;  %4127 = vmatprep.mubr.msk.bf16.mxu1 %vm721_vm3, %v1634_v32  ;;  %v4385_v45 = vld [vmem:[#allocation7 + $0x80] ss:$8 sps:$4 sm:$0xff]  }
 0x1b0   : > { %4133 = vmatprep.subr.bf16.mxu1 %v4329_v26 }
 0x1b3   : > { %4134 = vmatpush3.bf16.msra.mxu1 %v4329_v26 }
 0x1b4   : > { %4143 = vmatprep.subr.bf16.mxu1 %v4330_v18 }
 0x1b6   : > { %4128 = vmatmul.mubr.msk.bf16.gmra.mrb[4].mxu1 %vm721_vm3, %v1635_v9 }
 0x1b7   : > { %4135 = vmatprep.mubr.msk.bf16.mxu1 %vm721_vm3, %v4972_v24  ;;  %v4333_v24 = vld [vmem:[%s5545_s3 + $0x88] sm:$0xff]  }
 0x1be   : > { %4136 = vmatmul.mubr.msk.bf16.vlgmr.msra.gmra.mrb[0].mxu1 %vm721_vm3, %v5047_v57  ;;  %v1867_v57 = vld [vmem:[#allocation4 + $0x49] sm:$0xff] }
 0x1bf   : > { %4144 = vmatpush3.bf16.msra.mxu1 %v4330_v18  ;;  %4139 = vmatprep.mubr.msk.bf16.mxu1 %vm721_vm3, %v5111_v59  ;;  %v1871_v36 = vpack.c.bf16 %v1867_v57, %v1509_v6  ;;  %v4334_v59 = vld [vmem:[#allocation7 + $0x100] ss:$8 sps:$4 sm:$0xff]   ;;  %v4390_v6 = vld [vmem:[#allocation7 + $0x194] ss:$8 sps:$4 sm:$0xff]  }
 0x1c0   : > { %4145 = vmatprep.subr.bf16.mxu1 %v4331_v33  ;;  %3279 = vmatpush1.bf16.msra.mxu0 %v4334_v59 }
 0x1c1   : > { %3280 = vmatprep.subr.bf16.mxu0 %v4342_v25 }
 0x1c3   : > { %4146 = vmatpush3.bf16.msra.mxu1 %v4331_v33  ;;  %v4643_v33 = vmov 1966171168  }
 0x1c4   : > { %4155 = vmatprep.subr.bf16.mxu1 %v4332_v35  ;;  %3281 = vmatpush1.bf16.msra.mxu0 %v4340_v30 }
 0x1c5   : > { %3282 = vmatprep.subr.bf16.mxu0 %v4348_v21 }
 0x1c6   : > { %4140 = vmatmul.mubr.msk.bf16.gmra.mrb[4].mxu1 %vm721_vm3, %v5158_v56  ;;  %v4351_v56 = vld [vmem:[#allocation7 + $0x24] ss:$8 sps:$4 sm:$0xff]  }
 0x1c7   : > { %4147 = vmatprep.mubr.msk.bf16.mxu1 %vm721_vm3, %v4925_v37  ;;  %v1981_v37 = vld [vmem:[#allocation4 + $0x4a] sm:$0xff] }
 0x1ce   : > { %4148 = vmatmul.mubr.msk.bf16.vlgmr.msra.gmra.mrb[0].mxu1 %vm721_vm3, %v5027_v48  ;;  %v1988_v48 = vsel %vm5199_vm11, %v1623_v47, 0.0 }
 0x1cf   : > { %4156 = vmatpush3.bf16.msra.mxu1 %v4332_v35  ;;  %4151 = vmatprep.mubr.msk.bf16.mxu1 %vm721_vm3, %v5090_v10  ;;  %v1989_v10 = vsel %vm5194_vm4, %v1981_v37, 0.0  ;;  %v2149_v35 = vunpack.c.l.s4 %v4643_v33 }
 0x1d0   : > { %4157 = vmatprep.subr.bf16.mxu1 %v4333_v24  ;;  %v1993_v53 = vpack.c.bf16 %v1989_v10, %v1988_v48 }
 0x1d1   : > { %v2150_v3 = vunpack.c.0.s8 %v2149_v35 }
 0x1d3   : > { %4158 = vmatpush3.bf16.msra.mxu1 %v4333_v24 }
 0x1d6   : > { %4152 = vmatmul.mubr.msk.bf16.gmra.mrb[4].mxu1 %vm721_vm3, %v1871_v36 }
 0x1d7   : > { %4159 = vmatprep.mubr.msk.bf16.mxu1 %vm721_vm3, %v5016_v27  ;;  %v4339_v27 = vld [vmem:[#allocation7 + $0x4] ss:$8 sps:$4 sm:$0xff]  }
 0x1d8   : > { %3237 = vmatprep.subr.bf16.mxu1 %v4339_v27  ;;  %v4396_v27 = vld [vmem:[#allocation7 + $0x1a4] ss:$8 sps:$4 sm:$0xff]  }
 0x1de   : > { %4160 = vmatmul.mubr.msk.bf16.vlgmr.msra.gmra.mrb[0].mxu1 %vm721_vm3, %v5073_v20  ;;  %v4345_v20 = vld [vmem:[#allocation7 + $0x14] ss:$8 sps:$4 sm:$0xff]  }
 0x1df   : > { %4163 = vmatprep.mubr.msk.bf16.mxu1 %vm721_vm3, %v5160_v62  ;;  %3238 = vmatpush1.bf16.msra.mxu1 %v4337_v7  ;;  %v4346_v62 = vld [vmem:[#allocation7 + $0x120] ss:$8 sps:$4 sm:$0xff]  }
 0x1e0   : > { %3239 = vmatprep.subr.bf16.mxu1 %v4345_v20  ;;  %3283 = vmatpush1.bf16.msra.mxu0 %v4346_v62  ;;  %v4394_v7 = vld [vmem:[#allocation7 + $0x1a0] ss:$8 sps:$4 sm:$0xff]  }
 0x1e1   : > { %3284 = vmatprep.subr.bf16.mxu0 %v4354_v60 }
 0x1e3   : > { %3240 = vmatpush1.bf16.msra.mxu1 %v4343_v31 }
 0x1e4   : > { %3241 = vmatprep.subr.bf16.mxu1 %v4351_v56  ;;  %3285 = vmatpush1.bf16.msra.mxu0 %v4352_v58  ;;  %v5345_v58 = vsub.s32 %v2150_v3, %v4895_v63 }
 0x1e5   : > { %3286 = vmatprep.subr.bf16.mxu0 %v4360_v28 }
 0x1e6   : > { %4164 = vmatmul.mubr.msk.bf16.gmra.mrb[4].mxu1 %vm721_vm3, %v1993_v53  ;;  %vm2119_vm3 = vcmask 523264  }
 0x1e7   : > { %3242 = vmatpush1.bf16.msra.mxu1 %v4349_v13 }
 0x1e8   : > { %3243 = vmatprep.subr.bf16.mxu1 %v4357_v14  ;;  %3287 = vmatpush1.bf16.msra.mxu0 %v4358_v1 }
 0x1e9   : > { %3288 = vmatprep.subr.bf16.mxu0 %v4366_v51 }
 0x1eb   : > { %3244 = vmatpush1.bf16.msra.mxu1 %v4355_v23 }
 0x1ec   : > { %3245 = vmatprep.subr.bf16.mxu1 %v4363_v0  ;;  %3289 = vmatpush1.bf16.msra.mxu0 %v4364_v39 }
 0x1ed   : > { %3290 = vmatprep.subr.bf16.mxu0 %v4372_v15 }
 0x1ef   : > { %3246 = vmatpush1.bf16.msra.mxu1 %v4361_v61 }
 0x1f0   : > { %3247 = vmatprep.subr.bf16.mxu1 %v4369_v54  ;;  %3291 = vmatpush1.bf16.msra.mxu0 %v4370_v17 }
 0x1f1   : > { %3292 = vmatprep.subr.bf16.mxu0 %v4378_v2 }
 0x1f3   : > { %3248 = vmatpush1.bf16.msra.mxu1 %v4367_v43 }
 0x1f4   : > { %3249 = vmatprep.subr.bf16.mxu1 %v4375_v42  ;;  %3293 = vmatpush1.bf16.msra.mxu0 %v4376_v16 }
 0x1f5   : > { %3294 = vmatprep.subr.bf16.mxu0 %v4384_v41 }
 0x1f7   : > { %3250 = vmatpush1.bf16.msra.mxu1 %v4373_v55 }
 0x1f8   : > { %3251 = vmatprep.subr.bf16.mxu1 %v4381_v40  ;;  %3295 = vmatpush1.bf16.msra.mxu0 %v4382_v4 }
 0x1f9   : > { %3296 = vmatprep.subr.bf16.mxu0 %v4390_v6 }
 0x1fb   : > { %3252 = vmatpush1.bf16.msra.mxu1 %v4379_v22 }
 0x1fc   : > { %3253 = vmatprep.subr.bf16.mxu1 %v4387_v49  ;;  %3297 = vmatpush1.bf16.msra.mxu0 %v4388_v38 }
 0x1fd   : > { %3298 = vmatprep.subr.bf16.mxu0 %v4396_v27 }
 0x1ff   : > { %3254 = vmatpush1.bf16.msra.mxu1 %v4385_v45 }
 0x200   : > { %3255 = vmatprep.subr.bf16.mxu1 %v4393_v11  ;;  %3299 = vmatpush1.bf16.msra.mxu0 %v4394_v7 }
 0x203   : > { %3256 = vmatpush1.bf16.msra.mxu1 %v4391_v34 }
 0x2b1   : > { %v4161_v19 = vpop.f32.mrb[0].mxu1 }
 0x2b2   : > { %v2105_v46 = vadd.f32 %v4161_v19, %v3783_v12  ;;  %v2057_v29 = vpop.f32.mrb[1].mxu1 }
 0x2b3   : > { %v2103_v44 = vadd.f32 %v3783_v12, %v2057_v29  ;;  %v4162_v8 = vpop.f32.mrb[2].mxu1 }
 0x2b4   : > { %v2113_v26 = vmax.f32 %v2105_v46, 0.0  ;;  %v2106_v32 = vadd.f32 %v4162_v8, %v3783_v12  ;;  %v2060_v47 = vpop.f32.mrb[3].mxu1 }
 0x2b5   : > { %v2111_v18 = vmax.f32 %v2103_v44, 0.0  ;;  %v2104_v52 = vadd.f32 %v3783_v12, %v2060_v47  ;;  %v4483_v44 = vld [vmem:[#allocation7 + $0x314] ss:$8 sps:$4 sm:$0xff]  }
 0x2b6   : > { %2122 = vst.msk [vmem:[#allocation5 + $0x10] sm:$0xff] %vm2119_vm3, %v2113_v26  ;;  %v2114_v5 = vmax.f32 %v2106_v32, 0.0 }
 0x2b7   : > { %2120 = vst.msk [vmem:[#allocation5] sm:$0xff] %vm2119_vm3, %v2111_v18  ;;  %v2112_v9 = vmax.f32 %v2104_v52, 0.0 }
 0x2b8   : > { %2123 = vst.msk [vmem:[#allocation5 + $0x18] sm:$0xff] %vm2119_vm3, %v2114_v5 }
 0x2b9   : > { %2121 = vst.msk [vmem:[#allocation5 + $0x8] sm:$0xff] %vm2119_vm3, %v2112_v9  ;;  %v4165_v24 = vpop.f32.mrb[4].mxu1 }
 0x2ba   : > { %v2109_v57 = vadd.f32 %v4165_v24, %v3783_v12  ;;  %v2073_v36 = vpop.f32.mrb[5].mxu1 }
 0x2bb   : > { %v2107_v37 = vadd.f32 %v3783_v12, %v2073_v36  ;;  %v4166_v48 = vpop.f32.mrb[6].mxu1 }
 0x2bc   : > { %v2117_v10 = vmax.f32 %v2109_v57, 0.0  ;;  %v2110_v53 = vadd.f32 %v4166_v48, %v3783_v12  ;;  %v2076_v59 = vpop.f32.mrb[7].mxu1 }
 0x2bd   : > { %v2115_v25 = vmax.f32 %v2107_v37, 0.0  ;;  %v2108_v20 = vadd.f32 %v3783_v12, %v2076_v59  ;;  %v2211_v30 = vld [vmem:[#allocation5 + $0x12] sm:$0x1]  ;;  %v2212_v31 = vld [vmem:[#allocation5 + $0x13] sm:$0x1] }
 0x2be   : > { %2126 = vst.msk [vmem:[#allocation5 + $0x30] sm:$0xff] %vm2119_vm3, %v2117_v10  ;;  %v2118_v21 = vmax.f32 %v2110_v53, 0.0  ;;  %v2140_v56 = vld [vmem:[#allocation5 + $0x2] sm:$0x1]  ;;  %v2141_v62 = vld [vmem:[#allocation5 + $0x3] sm:$0x1]  ;;  %v2213_v23 = vmax.f32 %v2211_v30, %v2212_v31 }
 0x2bf   : > { %2124 = vst.msk [vmem:[#allocation5 + $0x20] sm:$0xff] %vm2119_vm3, %v2115_v25  ;;  %v2116_v13 = vmax.f32 %v2108_v20, 0.0  ;;  %v2214_v60 = vld [vmem:[#allocation5 + $0x1a] sm:$0x1]  ;;  %v2215_v14 = vld [vmem:[#allocation5 + $0x1b] sm:$0x1]  ;;  %v2142_v51 = vmax.f32 %v2140_v56, %v2141_v62 }
 0x2c0   : > { %2127 = vst.msk [vmem:[#allocation5 + $0x38] sm:$0xff] %vm2119_vm3, %v2118_v21  ;;  %v2216_v28 = vmax.f32 %v2214_v60, %v2215_v14  ;;  %v2143_v0 = vld [vmem:[#allocation5 + $0xa] sm:$0x1]  ;;  %v2144_v1 = vld [vmem:[#allocation5 + $0xb] sm:$0x1] }
 0x2c1   : > { %v2245_v61 = vld [vmem:[#allocation5 + $0x16] sm:$0x1]  ;;  %2125 = vst.msk [vmem:[#allocation5 + $0x28] sm:$0xff] %vm2119_vm3, %v2116_v13  ;;  %v2145_v54 = vmax.f32 %v2143_v0, %v2144_v1  ;;  %v2246_v39 = vld [vmem:[#allocation5 + $0x17] sm:$0x1] }
 0x2c2   : > { %v2248_v43 = vld [vmem:[#allocation5 + $0x1e] sm:$0x1]  ;;  %v2249_v15 = vld [vmem:[#allocation5 + $0x1f] sm:$0x1]  ;;  %v2217_v42 = vmax.f32 %v2213_v23, %v2216_v28  ;;  %v2247_v17 = vmax.f32 %v2245_v61, %v2246_v39  ;;  %v2177_v2 = vld [vmem:[#allocation5 + $0x6] sm:$0x1] }
 0x2c3   : > { %v2250_v55 = vmax.f32 %v2248_v43, %v2249_v15  ;;  %v2178_v40 = vld [vmem:[#allocation5 + $0x7] sm:$0x1]  ;;  %v2180_v16 = vld [vmem:[#allocation5 + $0xe] sm:$0x1]  ;;  %v2146_v22 = vmax.f32 %v2142_v51, %v2145_v54  ;;  %v2181_v41 = vld [vmem:[#allocation5 + $0xf] sm:$0x1] }
 0x2c4   : > { %v2203_v49 = vld [vmem:[#allocation5 + $0x10] sm:$0x1]  ;;  %v2204_v4 = vld [vmem:[#allocation5 + $0x11] sm:$0x1]  ;;  %v2225_v45 = vrot.slane %v2217_v42, %v5345_v58  ;;  %v2179_v11 = vmax.f32 %v2177_v2, %v2178_v40  ;;  %v2182_v38 = vmax.f32 %v2180_v16, %v2181_v41  ;;  %v2206_v34 = vld [vmem:[#allocation5 + $0x18] sm:$0x1] }
 0x2c5   : > { %v2251_v6 = vmax.f32 %v2247_v17, %v2250_v55  ;;  %v2207_v12 = vld [vmem:[#allocation5 + $0x19] sm:$0x1]  ;;  %v2154_v19 = vrot.slane %v2146_v22, %v5345_v58  ;;  %v2381_v46 = vld [vmem:[#allocation5 + $0x36] sm:$0x1]  ;;  %v2382_v29 = vld [vmem:[#allocation5 + $0x37] sm:$0x1]  ;;  %v2205_v8 = vmax.f32 %v2203_v49, %v2204_v4 }
 0x2c6   : > { %v2208_v26 = vmax.f32 %v2206_v34, %v2207_v12  ;;  %v2232_v32 = vrot.slane %v2225_v45, %v5345_v58  ;;  %v2183_v18 = vmax.f32 %v2179_v11, %v2182_v38  ;;  %v2313_v52 = vld [vmem:[#allocation5 + $0x26] sm:$0x1]  ;;  %v2314_v5 = vld [vmem:[#allocation5 + $0x27] sm:$0x1]  ;;  %v2279_v9 = vld [vmem:[#allocation5 + $0x22] sm:$0x1]  ;;  %v2383_v30 = vmax.f32 %v2381_v46, %v2382_v29 }
 0x2c7   : > { %v2259_v47 = vrot.slane %v2251_v6, %v5345_v58  ;;  %v2347_v33 = vld [vmem:[#allocation5 + $0x32] sm:$0x1]  ;;  %v2161_v35 = vrot.slane %v2154_v19, %v5345_v58  ;;  %v2280_v24 = vld [vmem:[#allocation5 + $0x23] sm:$0x1]  ;;  %v2384_v57 = vld [vmem:[#allocation5 + $0x3e] sm:$0x1]  ;;  %v2315_v27 = vmax.f32 %v2313_v52, %v2314_v5 }
 0x2c8   : > { %v2385_v36 = vld [vmem:[#allocation5 + $0x3f] sm:$0x1]  ;;  %v2209_v37 = vmax.f32 %v2205_v8, %v2208_v26  ;;  %v2128_v48 = vld [vmem:[#allocation5] sm:$0x1]  ;;  %2233 = vrot.lane.b32.xlu1 %v2232_v32, %s4644_s28  ;;  %v2191_v10 = vrot.slane %v2183_v18, %v5345_v58  ;;  %v2316_v53 = vld [vmem:[#allocation5 + $0x2e] sm:$0x1]  ;;  %v2281_v13 = vmax.f32 %v2279_v9, %v2280_v24 }
 0x2c9   : > { %v2317_v59 = vld [vmem:[#allocation5 + $0x2f] sm:$0x1]  ;;  %v2282_v3 = vld [vmem:[#allocation5 + $0x2a] sm:$0x1]  ;;  %v2386_v7 = vmax.f32 %v2384_v57, %v2385_v36  ;;  %2162 = vrot.lane.b32.xlu0 %v2161_v35, %s4644_s28  ;;  %v2283_v20 = vld [vmem:[#allocation5 + $0x2b] sm:$0x1]  ;;  %v2266_v56 = vrot.slane %v2259_v47, %v5345_v58 }
 0x2ca   : > { %v2318_v25 = vmax.f32 %v2316_v53, %v2317_v59  ;;  %v2348_v31 = vld [vmem:[#allocation5 + $0x33] sm:$0x1]  ;;  %v2350_v21 = vld [vmem:[#allocation5 + $0x3a] sm:$0x1]  ;;  %2210 = vst.msk [vmem:[#allocation6 + $0x2] sm:$0x1] %vm5351_vm6, %v2209_v37  ;;  %v2198_v62 = vrot.slane %v2191_v10, %v5345_v58  ;;  %v2284_v60 = vmax.f32 %v2282_v3, %v2283_v20 }
 0x2cb   : > { %v2351_v14 = vld [vmem:[#allocation5 + $0x3b] sm:$0x1]  ;;  %v2129_v23 = vld [vmem:[#allocation5 + $0x1] sm:$0x1]  ;;  %v2131_v28 = vld [vmem:[#allocation5 + $0x8] sm:$0x1]  ;;  %v2387_v1 = vmax.f32 %v2383_v30, %v2386_v7  ;;  %v2349_v61 = vmax.f32 %v2347_v33, %v2348_v31 }
 0x2cc   : > { %v2319_v0 = vmax.f32 %v2315_v27, %v2318_v25  ;;  %v2352_v51 = vmax.f32 %v2350_v21, %v2351_v14  ;;  %v2132_v54 = vld [vmem:[#allocation5 + $0x9] sm:$0x1]  ;;  %v4399_v43 = vld [vmem:[#allocation7 + $0xa4] ss:$8 sps:$4 sm:$0xff]   ;;  %2267 = vrot.lane.b32.xlu1 %v2266_v56, %s4644_s28  ;;  %v2285_v15 = vmax.f32 %v2281_v13, %v2284_v60  ;;  %v2130_v42 = vmax.f32 %v2128_v48, %v2129_v23  ;;  %v2240_v40 = vld [vmem:[#allocation5 + $0x1c] sm:$0x1] }
 0x2cd   : > { %v4397_v39 = vld [vmem:[#allocation7 + $0xa0] ss:$8 sps:$4 sm:$0xff]   ;;  %v2133_v17 = vmax.f32 %v2131_v28, %v2132_v54  ;;  %v2237_v55 = vld [vmem:[#allocation5 + $0x14] sm:$0x1]  ;;  %v2238_v2 = vld [vmem:[#allocation5 + $0x15] sm:$0x1]  ;;  %2199 = vrot.lane.b32.xlu0 %v2198_v62, %s4644_s28  ;;  %3257 = vmatprep.subr.bf16.mxu1 %v4399_v43  ;;  %v2395_v29 = vrot.slane %v2387_v1, %v5345_v58 }
 0x2ce   : > { %v2327_v16 = vrot.slane %v2319_v0, %v5345_v58  ;;  %v2353_v22 = vmax.f32 %v2349_v61, %v2352_v51  ;;  %v2241_v41 = vld [vmem:[#allocation5 + $0x1d] sm:$0x1]  ;;  %v2169_v49 = vld [vmem:[#allocation5 + $0x4] sm:$0x1]  ;;  %v2170_v4 = vld [vmem:[#allocation5 + $0x5] sm:$0x1]  ;;  %v2293_v45 = vrot.slane %v2285_v15, %v5345_v58  ;;  %3258 = vmatpush1.bf16.msra.mxu1 %v4397_v39  ;;  %v2239_v11 = vmax.f32 %v2237_v55, %v2238_v2 }
 0x2cf   : > { %v2134_v6 = vmax.f32 %v2130_v42, %v2133_v17  ;;  %v2242_v38 = vmax.f32 %v2240_v40, %v2241_v41  ;;  %v2172_v34 = vld [vmem:[#allocation5 + $0xc] sm:$0x1]  ;;  %v2173_v12 = vld [vmem:[#allocation5 + $0xd] sm:$0x1]  ;;  %v4400_v19 = vld [vmem:[#allocation7 + $0x1b0] ss:$8 sps:$4 sm:$0xff]   ;;  %v2171_v8 = vmax.f32 %v2169_v49, %v2170_v4  ;;  %v2402_v27 = vrot.slane %v2395_v29, %v5345_v58 }
 0x2d0   : > { %v2334_v46 = vrot.slane %v2327_v16, %v5345_v58  ;;  %v2174_v26 = vmax.f32 %v2172_v34, %v2173_v12  ;;  %v4402_v32 = vld [vmem:[#allocation7 + $0x1b4] ss:$8 sps:$4 sm:$0xff]   ;;  %v4403_v47 = vld [vmem:[#allocation7 + $0xb0] ss:$8 sps:$4 sm:$0xff]   ;;  %v2300_v52 = vrot.slane %v2293_v45, %v5345_v58  ;;  %v2361_v5 = vrot.slane %v2353_v22, %v5345_v58  ;;  %v2308_v24 = vld [vmem:[#allocation5 + $0x2c] sm:$0x1] }
 0x2d1   : > { %v4405_v18 = vld [vmem:[#allocation7 + $0xb4] ss:$8 sps:$4 sm:$0xff]   ;;  %2139 = vst.msk [vmem:[#allocation6] sm:$0x1] %vm5351_vm6, %v2134_v6  ;;  %v2243_v9 = vmax.f32 %v2239_v11, %v2242_v38  ;;  %3300 = vmatprep.subr.bf16.mxu0 %v4402_v32  ;;  %v2309_v36 = vld [vmem:[#allocation5 + $0x2d] sm:$0x1] }
 0x2d2   : > { %v2305_v33 = vld [vmem:[#allocation5 + $0x24] sm:$0x1]  ;;  %v2306_v35 = vld [vmem:[#allocation5 + $0x25] sm:$0x1]  ;;  %2335 = vrot.lane.b32.xlu1 %v2334_v46, %s4644_s28  ;;  %v2175_v57 = vmax.f32 %v2171_v8, %v2174_v26  ;;  %v2271_v37 = vld [vmem:[#allocation5 + $0x20] sm:$0x1]  ;;  %2301 = vrot.lane.b32.xlu0 %v2300_v52, %s4644_s28  ;;  %v2310_v53 = vmax.f32 %v2308_v24, %v2309_v36  ;;  %v2368_v56 = vrot.slane %v2361_v5, %v5345_v58 }
 0x2d3   : > { %v2272_v48 = vld [vmem:[#allocation5 + $0x21] sm:$0x1]  ;;  %2244 = vst.msk [vmem:[#allocation6 + $0x3] sm:$0x1] %vm5351_vm6, %v2243_v9  ;;  %3259 = vmatprep.subr.bf16.mxu1 %v4405_v18  ;;  %v2307_v10 = vmax.f32 %v2305_v33, %v2306_v35  ;;  %v2274_v59 = vld [vmem:[#allocation5 + $0x28] sm:$0x1]  ;;  %3301 = vmatpush1.bf16.msra.mxu0 %v4400_v19 }
 0x2d4   : > { %v2275_v3 = vld [vmem:[#allocation5 + $0x29] sm:$0x1]  ;;  %2176 = vst.msk [vmem:[#allocation6 + $0x1] sm:$0x1] %vm5351_vm6, %v2175_v57  ;;  %3260 = vmatpush1.bf16.msra.mxu1 %v4403_v47  ;;  %v2273_v25 = vmax.f32 %v2271_v37, %v2272_v48  ;;  %v4408_v30 = vld [vmem:[#allocation7 + $0x1c4] ss:$8 sps:$4 sm:$0xff]  }
 0x2d5   : > { %v4406_v7 = vld [vmem:[#allocation7 + $0x1c0] ss:$8 sps:$4 sm:$0xff]   ;;  %v2276_v20 = vmax.f32 %v2274_v59, %v2275_v3  ;;  %v4411_v21 = vld [vmem:[#allocation7 + $0xc4] ss:$8 sps:$4 sm:$0xff]   ;;  %v2311_v62 = vmax.f32 %v2307_v10, %v2310_v53  ;;  %v2376_v14 = vld [vmem:[#allocation5 + $0x3c] sm:$0x1]  ;;  %3302 = vmatprep.subr.bf16.mxu0 %v4408_v30 }
 0x2d6   : > { %v4409_v31 = vld [vmem:[#allocation7 + $0xc0] ss:$8 sps:$4 sm:$0xff]   ;;  %v2373_v13 = vld [vmem:[#allocation5 + $0x34] sm:$0x1]  ;;  %v2374_v60 = vld [vmem:[#allocation5 + $0x35] sm:$0x1]  ;;  %2403 = vrot.lane.b32.xlu1 %v2402_v27, %s4644_s28  ;;  %2369 = vrot.lane.b32.xlu0 %v2368_v56, %s4644_s28 }
 0x2d7   : > { %v2277_v23 = vmax.f32 %v2273_v25, %v2276_v20  ;;  %v2377_v28 = vld [vmem:[#allocation5 + $0x3d] sm:$0x1]  ;;  %v2339_v0 = vld [vmem:[#allocation5 + $0x30] sm:$0x1]  ;;  %v2340_v1 = vld [vmem:[#allocation5 + $0x31] sm:$0x1]  ;;  %3261 = vmatprep.subr.bf16.mxu1 %v4411_v21  ;;  %v2375_v61 = vmax.f32 %v2373_v13, %v2374_v60  ;;  %3303 = vmatpush1.bf16.msra.mxu0 %v4406_v7 }
 0x2d8   : > { %2312 = vst.msk [vmem:[#allocation6 + $0x5] sm:$0x1] %vm5351_vm6, %v2311_v62  ;;  %v2378_v51 = vmax.f32 %v2376_v14, %v2377_v28  ;;  %v2342_v58 = vld [vmem:[#allocation5 + $0x38] sm:$0x1]  ;;  %v2343_v54 = vld [vmem:[#allocation5 + $0x39] sm:$0x1]  ;;  %3262 = vmatpush1.bf16.msra.mxu1 %v4409_v31  ;;  %v2341_v43 = vmax.f32 %v2339_v0, %v2340_v1 }
 0x2d9   : > { %v4412_v39 = vld [vmem:[#allocation7 + $0x1d0] ss:$8 sps:$4 sm:$0xff]   ;;  %2278 = vst.msk [vmem:[#allocation6 + $0x4] sm:$0x1] %vm5351_vm6, %v2277_v23  ;;  %v2344_v15 = vmax.f32 %v2342_v58, %v2343_v54  ;;  %v4414_v42 = vld [vmem:[#allocation7 + $0x1d4] ss:$8 sps:$4 sm:$0xff]  }
 0x2da   : > { %v4415_v17 = vld [vmem:[#allocation7 + $0xd0] ss:$8 sps:$4 sm:$0xff]   ;;  %v4417_v55 = vld [vmem:[#allocation7 + $0xd4] ss:$8 sps:$4 sm:$0xff]   ;;  %v2379_v2 = vmax.f32 %v2375_v61, %v2378_v51  ;;  %v4420_v40 = vld [vmem:[#allocation7 + $0x1e4] ss:$8 sps:$4 sm:$0xff]   ;;  %3304 = vmatprep.subr.bf16.mxu0 %v4414_v42 }
 0x2db   : > { %v2345_v16 = vmax.f32 %v2341_v43, %v2344_v15  ;;  %3263 = vmatprep.subr.bf16.mxu1 %v4417_v55  ;;  %v4423_v22 = vld [vmem:[#allocation7 + $0xe4] ss:$8 sps:$4 sm:$0xff]   ;;  %3305 = vmatpush1.bf16.msra.mxu0 %v4412_v39  ;;  %v4418_v41 = vld [vmem:[#allocation7 + $0x1e0] ss:$8 sps:$4 sm:$0xff]   ;;  %v4426_v4 = vld [vmem:[#allocation7 + $0x1f4] ss:$8 sps:$4 sm:$0xff]  }
 0x2dc   : > { %2380 = vst.msk [vmem:[#allocation6 + $0x7] sm:$0x1] %vm5351_vm6, %v2379_v2  ;;  %3264 = vmatpush1.bf16.msra.mxu1 %v4415_v17  ;;  %v4421_v49 = vld [vmem:[#allocation7 + $0xe0] ss:$8 sps:$4 sm:$0xff]   ;;  %3306 = vmatprep.subr.bf16.mxu0 %v4420_v40  ;;  %v4429_v45 = vld [vmem:[#allocation7 + $0xf4] ss:$8 sps:$4 sm:$0xff]  }
 0x2dd   : > { %2346 = vst.msk [vmem:[#allocation6 + $0x6] sm:$0x1] %vm5351_vm6, %v2345_v16  ;;  %3265 = vmatprep.subr.bf16.mxu1 %v4423_v22  ;;  %v4424_v6 = vld [vmem:[#allocation7 + $0x1f0] ss:$8 sps:$4 sm:$0xff]   ;;  %v4432_v38 = vld [vmem:[#allocation7 + $0x204] ss:$8 sps:$4 sm:$0xff]  }
 0x2de   : > { %v4427_v11 = vld [vmem:[#allocation7 + $0xf0] ss:$8 sps:$4 sm:$0xff]   ;;  %v2415_v32 = vsub.s32 1, %v4895_v63  ;;  %v2423_v47 = vsub.s32 3, %v4895_v63  ;;  %v2411_v18 = vsub.s32 0, %v4895_v63  ;;  %v2419_v52 = vsub.s32 2, %v4895_v63 }
 0x2df   : > { %3307 = vmatpush1.bf16.msra.mxu0 %v4418_v41  ;;  %v2431_v5 = vsub.s32 5, %v4895_v63  ;;  %v4430_v10 = vld [vmem:[#allocation7 + $0x200] ss:$8 sps:$4 sm:$0xff]   ;;  %v4435_v3 = vld [vmem:[#allocation7 + $0x214] ss:$8 sps:$4 sm:$0xff]   ;;  %v2427_v22 = vsub.s32 4, %v4895_v63 }
 0x2e0   : > { %3266 = vmatpush1.bf16.msra.mxu1 %v4421_v49  ;;  %3308 = vmatprep.subr.bf16.mxu0 %v4426_v4  ;;  %v4433_v27 = vld [vmem:[#allocation7 + $0x210] ss:$8 sps:$4 sm:$0xff]   ;;  %v4438_v25 = vld [vmem:[#allocation7 + $0x224] ss:$8 sps:$4 sm:$0xff]   ;;  %v4436_v20 = vld [vmem:[#allocation7 + $0x220] ss:$8 sps:$4 sm:$0xff]  }
 0x2e1   : > { %3267 = vmatprep.subr.bf16.mxu1 %v4429_v45  ;;  %v4441_v30 = vld [vmem:[#allocation7 + $0x234] ss:$8 sps:$4 sm:$0xff]   ;;  %v4439_v31 = vld [vmem:[#allocation7 + $0x230] ss:$8 sps:$4 sm:$0xff]   ;;  %v4444_v21 = vld [vmem:[#allocation7 + $0x244] ss:$8 sps:$4 sm:$0xff]  }
 0x2e2   : > { %v4442_v56 = vld [vmem:[#allocation7 + $0x240] ss:$8 sps:$4 sm:$0xff]   ;;  %v4447_v62 = vld [vmem:[#allocation7 + $0x254] ss:$8 sps:$4 sm:$0xff]   ;;  %v4445_v13 = vld [vmem:[#allocation7 + $0x250] ss:$8 sps:$4 sm:$0xff]  }
 0x2e3   : > { %3309 = vmatpush1.bf16.msra.mxu0 %v4424_v6  ;;  %v4450_v60 = vld [vmem:[#allocation7 + $0x264] ss:$8 sps:$4 sm:$0xff]   ;;  %v4448_v14 = vld [vmem:[#allocation7 + $0x260] ss:$8 sps:$4 sm:$0xff]   ;;  %v4453_v23 = vld [vmem:[#allocation7 + $0x274] ss:$8 sps:$4 sm:$0xff]  }
 0x2e4   : > { %3268 = vmatpush1.bf16.msra.mxu1 %v4427_v11  ;;  %3319 = vmatprep.subr.bf16.mxu0 %v4432_v38  ;;  %v4451_v28 = vld [vmem:[#allocation7 + $0x270] ss:$8 sps:$4 sm:$0xff]   ;;  %v4456_v0 = vld [vmem:[#allocation7 + $0x284] ss:$8 sps:$4 sm:$0xff]   ;;  %v4454_v1 = vld [vmem:[#allocation7 + $0x280] ss:$8 sps:$4 sm:$0xff]  }
 0x2e5   : > { %v4459_v61 = vld [vmem:[#allocation7 + $0x294] ss:$8 sps:$4 sm:$0xff]   ;;  %v4457_v51 = vld [vmem:[#allocation7 + $0x290] ss:$8 sps:$4 sm:$0xff]   ;;  %v4462_v58 = vld [vmem:[#allocation7 + $0x2a4] ss:$8 sps:$4 sm:$0xff]  }
 0x2e6   : > { %v4460_v54 = vld [vmem:[#allocation7 + $0x2a0] ss:$8 sps:$4 sm:$0xff]   ;;  %v4465_v39 = vld [vmem:[#allocation7 + $0x2b4] ss:$8 sps:$4 sm:$0xff]   ;;  %v4463_v43 = vld [vmem:[#allocation7 + $0x2b0] ss:$8 sps:$4 sm:$0xff]  }
 0x2e7   : > { %v4468_v15 = vld [vmem:[#allocation7 + $0x2c4] ss:$8 sps:$4 sm:$0xff]   ;;  %v4466_v42 = vld [vmem:[#allocation7 + $0x2c0] ss:$8 sps:$4 sm:$0xff]   ;;  %v4471_v17 = vld [vmem:[#allocation7 + $0x2d4] ss:$8 sps:$4 sm:$0xff]  }
 0x2e8   : > { %v4469_v55 = vld [vmem:[#allocation7 + $0x2d0] ss:$8 sps:$4 sm:$0xff]   ;;  %v4474_v2 = vld [vmem:[#allocation7 + $0x2e4] ss:$8 sps:$4 sm:$0xff]   ;;  %v4472_v40 = vld [vmem:[#allocation7 + $0x2e0] ss:$8 sps:$4 sm:$0xff]  }
 0x2e9   : > { %v4477_v16 = vld [vmem:[#allocation7 + $0x2f4] ss:$8 sps:$4 sm:$0xff]   ;;  %v2439_v41 = vsub.s32 7, %v4895_v63  ;;  %v4475_v49 = vld [vmem:[#allocation7 + $0x2f0] ss:$8 sps:$4 sm:$0xff]   ;;  %s4576_s28 = scalar_lea.vmem %s4575_s25, 32 }
 0x2ea   : > { %v4480_v45 = vld [vmem:[#allocation7 + $0x304] ss:$8 sps:$4 sm:$0xff]   ;;  %v4478_v11 = vld [vmem:[#allocation7 + $0x300] ss:$8 sps:$4 sm:$0xff]   ;;  %p4578_p3 = scmp.lt.s32.totalorder %s4576_s28, %s4570_s22 }
 0x2ec   : > { %p4579_p4 = por %p4578_p3, %p4577_p2 }
 0x2ee   : > { %p4580_p7 = pnand %p4579_p4, %p4573_p12 }
 0x33a   : > { %v2234_v34 = vpop.permute.xlu1 %2233 }
 0x33b   : > { %2236 = vst.msk [vmem:[#allocation6 + $0x2] sm:$0x1] %vm5395_vm9, %v2234_v34  ;;  %v2163_v12 = vpop.permute.xlu0 %2162 }
 0x33c   : > { %2168 = vst.msk [vmem:[#allocation6] sm:$0x1] %vm5395_vm9, %v2163_v12  ;;  %v4481_v12 = vld [vmem:[#allocation7 + $0x310] ss:$8 sps:$4 sm:$0xff]  }
 0x33e   : > { %v2268_v19 = vpop.permute.xlu1 %2267 }
 0x33f   : > { %2270 = vst.msk [vmem:[#allocation6 + $0x3] sm:$0x1] %vm5395_vm9, %v2268_v19  ;;  %v2200_v46 = vpop.permute.xlu0 %2199  ;;  %v4486_v19 = vld [vmem:[#allocation7 + $0x324] ss:$8 sps:$4 sm:$0xff]  }
 0x340   : > { %2202 = vst.msk [vmem:[#allocation6 + $0x1] sm:$0x1] %vm5395_vm9, %v2200_v46  ;;  %v4484_v46 = vld [vmem:[#allocation7 + $0x320] ss:$8 sps:$4 sm:$0xff]  }
 0x344   : > { %v2336_v50 = vpop.permute.xlu1 %2335  ;;  %v2302_v29 = vpop.permute.xlu0 %2301 }
 0x345   : > { %2338 = vst.msk [vmem:[#allocation6 + $0x5] sm:$0x1] %vm5395_vm9, %v2336_v50  ;;  %2304 = vst.msk [vmem:[#allocation6 + $0x4] sm:$0x1] %vm5395_vm9, %v2302_v29  ;;  %v4489_v50 = vld [vmem:[#allocation7 + $0x334] ss:$8 sps:$4 sm:$0xff]  }
 0x346   : > { %v4487_v29 = vld [vmem:[#allocation7 + $0x330] ss:$8 sps:$4 sm:$0xff]  }
 0x348   : > { %v2404_v8 = vpop.permute.xlu1 %2403  ;;  %v2370_v26 = vpop.permute.xlu0 %2369 }
 0x349   : > { %2406 = vst.msk [vmem:[#allocation6 + $0x7] sm:$0x1] %vm5395_vm9, %v2404_v8  ;;  %2372 = vst.msk [vmem:[#allocation6 + $0x6] sm:$0x1] %vm5395_vm9, %v2370_v26  ;;  %v4492_v8 = vld [vmem:[#allocation7 + $0x344] ss:$8 sps:$4 sm:$0xff]  }
 0x34a   : > { %v4490_v26 = vld [vmem:[#allocation7 + $0x340] ss:$8 sps:$4 sm:$0xff]  }
 0x350   : > { %v5420_v9 = vld [vmem:[#allocation6] sm:$0xff] }
 0x351   : > { %v2416_v33 = vrot.slane %v5420_v9, %v2415_v32  ;;  %v2424_v35 = vrot.slane %v5420_v9, %v2423_v47  ;;  %v2412_v24 = vrot.slane %v5420_v9, %v2411_v18  ;;  %v2420_v57 = vrot.slane %v5420_v9, %v2419_v52  ;;  %v4495_v47 = vld [vmem:[#allocation7 + $0x354] ss:$8 sps:$4 sm:$0xff]   ;;  %v4493_v52 = vld [vmem:[#allocation7 + $0x350] ss:$8 sps:$4 sm:$0xff]  }
 0x352   : > { %v2432_v36 = vrot.slane %v5420_v9, %v2431_v5  ;;  %v2428_v4 = vrot.slane %v5420_v9, %v2427_v22  ;;  %v2440_v6 = vrot.slane %v5420_v9, %v2439_v41  ;;  %v4498_v5 = vld [vmem:[#allocation7 + $0x364] ss:$8 sps:$4 sm:$0xff]   ;;  %v4538_v22 = vld [vmem:[%s5549_s7 + $0x70] sm:$0xff]  }
 0x353   : > { %v2450_v37 = vpack.c.bf16 %v2416_v33, %v2416_v33  ;;  %v2452_v48 = vpack.c.bf16 %v2424_v35, %v2424_v35  ;;  %v2449_v53 = vpack.c.bf16 %v2412_v24, %v2412_v24  ;;  %v2451_v59 = vpack.c.bf16 %v2420_v57, %v2420_v57  ;;  %v4496_v33 = vld [vmem:[#allocation7 + $0x360] ss:$8 sps:$4 sm:$0xff]   ;;  %v4501_v35 = vld [vmem:[#allocation7 + $0x374] ss:$8 sps:$4 sm:$0xff]   ;;  %v4499_v24 = vld [vmem:[#allocation7 + $0x370] ss:$8 sps:$4 sm:$0xff]  }
 0x354   : > { %v2454_v7 = vpack.c.bf16 %v2432_v36, %v2432_v36  ;;  %v2453_v38 = vpack.c.bf16 %v2428_v4, %v2428_v4  ;;  %v2456_v34 = vpack.c.bf16 %v2440_v6, %v2440_v6  ;;  %v4504_v57 = vld [vmem:[#allocation7 + $0x384] ss:$8 sps:$4 sm:$0xff]   ;;  %v4502_v36 = vld [vmem:[#allocation7 + $0x380] ss:$8 sps:$4 sm:$0xff]   ;;  %v4539_v41 = vld [vmem:[%s5549_s7 + $0x30] sm:$0xff]  }
 0x355   : > { %3269 = vmatprep.mubr.bf16.mxu1 %v2450_v37  ;;  %3310 = vmatprep.mubr.bf16.mxu0 %v2452_v48  ;;  %v4507_v37 = vld [vmem:[#allocation7 + $0x394] ss:$8 sps:$4 sm:$0xff]   ;;  %v4505_v48 = vld [vmem:[#allocation7 + $0x390] ss:$8 sps:$4 sm:$0xff]  }
 0x356   : > { %3270 = vmatmul.mubr.bf16.vlgmr.msra.gmra.mrb[8].mxu1 %v2449_v53  ;;  %3311 = vmatmul.mubr.bf16.vlgmr.msra.gmra.mrb[32].mxu0 %v2451_v59  ;;  %v4508_v53 = vld [vmem:[#allocation7 + $0x3a0] ss:$8 sps:$4 sm:$0xff]   ;;  %v4513_v59 = vld [vmem:[#allocation7 + $0x3b4] ss:$8 sps:$4 sm:$0xff]  }
 0x357   : > { %3320 = vmatpush1.bf16.msra.mxu0 %v4430_v10  ;;  %3351 = vmatprep.mubr.bf16.mxu0 %v2454_v7  ;;  %v4510_v10 = vld [vmem:[#allocation7 + $0x3a4] ss:$8 sps:$4 sm:$0xff]  }
 0x358   : > { %3321 = vmatprep.subr.bf16.mxu0 %v4435_v3  ;;  %v4511_v3 = vld [vmem:[#allocation7 + $0x3b0] ss:$8 sps:$4 sm:$0xff]   ;;  %v4516_v7 = vld [vmem:[#allocation7 + $0x3c4] ss:$8 sps:$4 sm:$0xff]  }
 0x35b   : > { %3322 = vmatpush1.bf16.msra.mxu0 %v4433_v27  ;;  %v4514_v27 = vld [vmem:[#allocation7 + $0x3c0] ss:$8 sps:$4 sm:$0xff]  }
 0x35c   : > { %3323 = vmatprep.subr.bf16.mxu0 %v4438_v25  ;;  %v4519_v25 = vld [vmem:[#allocation7 + $0x3d4] ss:$8 sps:$4 sm:$0xff]  }
 0x35f   : > { %3324 = vmatpush1.bf16.msra.mxu0 %v4436_v20  ;;  %v4517_v20 = vld [vmem:[#allocation7 + $0x3d0] ss:$8 sps:$4 sm:$0xff]  }
 0x360   : > { %3325 = vmatprep.subr.bf16.mxu0 %v4441_v30  ;;  %v4522_v30 = vld [vmem:[#allocation7 + $0x3e4] ss:$8 sps:$4 sm:$0xff]  }
 0x363   : > { %3326 = vmatpush1.bf16.msra.mxu0 %v4439_v31  ;;  %v4520_v31 = vld [vmem:[#allocation7 + $0x3e0] ss:$8 sps:$4 sm:$0xff]  }
 0x364   : > { %3327 = vmatprep.subr.bf16.mxu0 %v4444_v21  ;;  %v4525_v21 = vld [vmem:[#allocation7 + $0x3f4] ss:$8 sps:$4 sm:$0xff]  }
 0x367   : > { %3328 = vmatpush1.bf16.msra.mxu0 %v4442_v56  ;;  %v2435_v56 = vsub.s32 6, %v4895_v63  ;;  %v3437_v63 = vld [vmem:[%s5550_s8] sm:$0x1] }
 0x368   : > { %3329 = vmatprep.subr.bf16.mxu0 %v4447_v62  ;;  %v4523_v62 = vld [vmem:[#allocation7 + $0x3f0] ss:$8 sps:$4 sm:$0xff]  }
 0x36b   : > { %3330 = vmatpush1.bf16.msra.mxu0 %v4445_v13  ;;  %v2436_v13 = vrot.slane %v5420_v9, %v2435_v56  ;;  %v4529_v9 = vld [vmem:[%s5549_s7 + $0x8] sm:$0xff]  }
 0x36c   : > { %3331 = vmatprep.subr.bf16.mxu0 %v4450_v60  ;;  %v4526_v60 = vld [vmem:[%s5549_s7 + $0x40] sm:$0xff]  }
 0x36f   : > { %3332 = vmatpush1.bf16.msra.mxu0 %v4448_v14  ;;  %v4527_v14 = vld [vmem:[%s5549_s7] sm:$0xff]  }
 0x370   : > { %3333 = vmatprep.subr.bf16.mxu0 %v4453_v23  ;;  %v2455_v23 = vpack.c.bf16 %v2436_v13, %v2436_v13 }
 0x373   : > { %3334 = vmatpush1.bf16.msra.mxu0 %v4451_v28  ;;  %v4528_v28 = vld [vmem:[%s5549_s7 + $0x48] sm:$0xff]  }
 0x374   : > { %3335 = vmatprep.subr.bf16.mxu0 %v4456_v0  ;;  %v4530_v0 = vld [vmem:[%s5549_s7 + $0x50] sm:$0xff]  }
 0x377   : > { %3336 = vmatpush1.bf16.msra.mxu0 %v4454_v1  ;;  %v4531_v1 = vld [vmem:[%s5549_s7 + $0x10] sm:$0xff]  }
 0x378   : > { %3337 = vmatprep.subr.bf16.mxu0 %v4459_v61  ;;  %v4532_v61 = vld [vmem:[%s5549_s7 + $0x58] sm:$0xff]  }
 0x37b   : > { %3338 = vmatpush1.bf16.msra.mxu0 %v4457_v51  ;;  %v4533_v51 = vld [vmem:[%s5549_s7 + $0x18] sm:$0xff]  }
 0x37c   : > { %3339 = vmatprep.subr.bf16.mxu0 %v4462_v58  ;;  %v4534_v58 = vld [vmem:[%s5549_s7 + $0x60] sm:$0xff]  }
 0x37f   : > { %3340 = vmatpush1.bf16.msra.mxu0 %v4460_v54  ;;  %v4535_v54 = vld [vmem:[%s5549_s7 + $0x20] sm:$0xff]  }
 0x380   : > { %3341 = vmatprep.subr.bf16.mxu0 %v4465_v39  ;;  %v4536_v39 = vld [vmem:[%s5549_s7 + $0x68] sm:$0xff]  }
 0x383   : > { %3342 = vmatpush1.bf16.msra.mxu0 %v4463_v43  ;;  %v4537_v43 = vld [vmem:[%s5549_s7 + $0x28] sm:$0xff]  }
 0x384   : > { %3343 = vmatprep.subr.bf16.mxu0 %v4468_v15  ;;  %v2585_v15 = vld [vmem:[%s5548_s6] sm:$0x3] }
 0x385   : > { %v3234_v4 = vrot.slane %v2585_v15, %v2415_v32 }
 0x387   : > { %3344 = vmatpush1.bf16.msra.mxu0 %v4466_v42  ;;  %v3230_v42 = vrot.slane %v2585_v15, %v2411_v18  ;;  %v4541_v18 = vld [vmem:[%s5549_s7 + $0x38] sm:$0xff]  }
 0x388   : > { %3345 = vmatprep.subr.bf16.mxu0 %v4471_v17 }
 0x38b   : > { %3346 = vmatpush1.bf16.msra.mxu0 %v4469_v55 }
 0x38c   : > { %3347 = vmatprep.subr.bf16.mxu0 %v4474_v2 }
 0x38f   : > { %3348 = vmatpush1.bf16.msra.mxu0 %v4472_v40 }
 0x390   : > { %3349 = vmatprep.subr.bf16.mxu0 %v4477_v16 }
 0x393   : > { %3350 = vmatpush1.bf16.msra.mxu0 %v4475_v49  ;;  %v4540_v49 = vld [vmem:[%s5549_s7 + $0x78] sm:$0xff]  }
 0x394   : > { %3360 = vmatprep.subr.bf16.mxu0 %v4480_v45 }
 0x396   : > { %3352 = vmatmul.mubr.bf16.vlgmr.msra.gmra.mrb[32].mxu0 %v2453_v38 }
 0x397   : > { %3361 = vmatpush1.bf16.msra.mxu0 %v4478_v11  ;;  %3392 = vmatprep.mubr.bf16.mxu0 %v2456_v34 }
 0x398   : > { %3362 = vmatprep.subr.bf16.mxu0 %v4483_v44 }
 0x39b   : > { %3363 = vmatpush1.bf16.msra.mxu0 %v4481_v12 }
 0x39c   : > { %3364 = vmatprep.subr.bf16.mxu0 %v4486_v19 }
 0x39f   : > { %3365 = vmatpush1.bf16.msra.mxu0 %v4484_v46 }
 0x3a0   : > { %3366 = vmatprep.subr.bf16.mxu0 %v4489_v50 }
 0x3a3   : > { %3367 = vmatpush1.bf16.msra.mxu0 %v4487_v29 }
 0x3a4   : > { %3368 = vmatprep.subr.bf16.mxu0 %v4492_v8 }
 0x3a7   : > { %3369 = vmatpush1.bf16.msra.mxu0 %v4490_v26 }
 0x3a8   : > { %3370 = vmatprep.subr.bf16.mxu0 %v4495_v47 }
 0x3ab   : > { %3371 = vmatpush1.bf16.msra.mxu0 %v4493_v52 }
 0x3ac   : > { %3372 = vmatprep.subr.bf16.mxu0 %v4498_v5 }
 0x3af   : > { %3373 = vmatpush1.bf16.msra.mxu0 %v4496_v33 }
 0x3b0   : > { %3374 = vmatprep.subr.bf16.mxu0 %v4501_v35 }
 0x3b3   : > { %3375 = vmatpush1.bf16.msra.mxu0 %v4499_v24 }
 0x3b4   : > { %3376 = vmatprep.subr.bf16.mxu0 %v4504_v57 }
 0x3b7   : > { %3377 = vmatpush1.bf16.msra.mxu0 %v4502_v36 }
 0x3b8   : > { %3378 = vmatprep.subr.bf16.mxu0 %v4507_v37 }
 0x3bb   : > { %3379 = vmatpush1.bf16.msra.mxu0 %v4505_v48 }
 0x3bc   : > { %3380 = vmatprep.subr.bf16.mxu0 %v4510_v10 }
 0x3bf   : > { %3381 = vmatpush1.bf16.msra.mxu0 %v4508_v53 }
 0x3c0   : > { %3382 = vmatprep.subr.bf16.mxu0 %v4513_v59 }
 0x3c3   : > { %3383 = vmatpush1.bf16.msra.mxu0 %v4511_v3 }
 0x3c4   : > { %3384 = vmatprep.subr.bf16.mxu0 %v4516_v7 }
 0x3c7   : > { %3385 = vmatpush1.bf16.msra.mxu0 %v4514_v27 }
 0x3c8   : > { %3386 = vmatprep.subr.bf16.mxu0 %v4519_v25 }
 0x3cb   : > { %3387 = vmatpush1.bf16.msra.mxu0 %v4517_v20 }
 0x3cc   : > { %3388 = vmatprep.subr.bf16.mxu0 %v4522_v30 }
 0x3cf   : > { %3389 = vmatpush1.bf16.msra.mxu0 %v4520_v31 }
 0x3d0   : > { %3390 = vmatprep.subr.bf16.mxu0 %v4525_v21 }
 0x3d3   : > { %3391 = vmatpush1.bf16.msra.mxu0 %v4523_v62 }
 0x3d4   : > { %4003 = vmatprep.subr.bf16.mxu0 %v4526_v60 }
 0x3d6   : > { %3393 = vmatmul.mubr.bf16.vlgmr.msra.gmra.mrb[32].mxu0 %v2455_v23 }
 0x3d7   : > { %4004 = vmatpush3.bf16.msra.mxu0 %v4527_v14 }
 0x3d8   : > { %4005 = vmatprep.subr.bf16.mxu0 %v4528_v28 }
 0x3db   : > { %4006 = vmatpush3.bf16.msra.mxu0 %v4529_v9 }
 0x3dc   : > { %4007 = vmatprep.subr.bf16.mxu0 %v4530_v0 }
 0x3df   : > { %4008 = vmatpush3.bf16.msra.mxu0 %v4531_v1 }
 0x3e0   : > { %4009 = vmatprep.subr.bf16.mxu0 %v4532_v61 }
 0x3e3   : > { %4010 = vmatpush3.bf16.msra.mxu0 %v4533_v51 }
 0x3e4   : > { %4011 = vmatprep.subr.bf16.mxu0 %v4534_v58 }
 0x3e7   : > { %4012 = vmatpush3.bf16.msra.mxu0 %v4535_v54 }
 0x3e8   : > { %4013 = vmatprep.subr.bf16.mxu0 %v4536_v39 }
 0x3eb   : > { %4014 = vmatpush3.bf16.msra.mxu0 %v4537_v43 }
 0x3ec   : > { %4015 = vmatprep.subr.bf16.mxu0 %v4538_v22 }
 0x3ef   : > { %4016 = vmatpush3.bf16.msra.mxu0 %v4539_v41 }
 0x3f0   : > { %4017 = vmatprep.subr.bf16.mxu0 %v4540_v49 }
 0x3f3   : > { %4018 = vmatpush3.bf16.msra.mxu0 %v4541_v18 }
 0x429   : > { %v3271_v17 = vpop.f32.mrb[8].mxu1 }
 0x42a   : > { %v3272_v55 = vadd.f32 %v3271_v17, %v3230_v42  ;;  %v3273_v2 = vpop.f32.mrb[9].mxu1 }
 0x42b   : > { %v3275_v40 = vpop.f32.mrb[10].mxu1  ;;  %v3274_v45 = vadd.f32 %v3273_v2, %v3234_v4 }
 0x42c   : > { %v3276_v16 = vpop.f32.mrb[11].mxu1 }
 0x4a9   : > { %v3394_v6 = vpop.f32.mrb[32].mxu0 }
 0x4aa   : > { %v4168_v11 = vadd.f32 %v3394_v6, %v3272_v55  ;;  %v3396_v38 = vpop.f32.mrb[33].mxu0 }
 0x4ab   : > { %v4170_v44 = vadd.f32 %v3396_v38, %v3274_v45  ;;  %v3398_v34 = vpop.f32.mrb[34].mxu0 }
 0x4ac   : > { %v3401_v12 = vmax.f32 %v4168_v11, 0.0  ;;  %v3399_v19 = vpop.f32.mrb[35].mxu0 }
 0x4ad   : > { %v3402_v46 = vmax.f32 %v4170_v44, 0.0 }
 0x4ae   : > { %v3403_v29 = vpack.c.bf16 %v3401_v12, %v3401_v12 }
 0x4af   : > { %v3404_v50 = vpack.c.bf16 %v3402_v46, %v3402_v46 }
 0x4b1   : > { %3566 = vmatprep.mubr.bf16.mxu0 %v3404_v50 }
 0x4b2   : > { %3567 = vmatmul.mubr.bf16.vlgmr.msra.gmra.mrb[36].mxu0 %v3403_v29 }
 0x585   : > { %v4019_v8 = vpop.f32.mrb[36].mxu0 }
 0x586   : > { %v4020_v32 = vpop.f32.mrb[37].mxu0 }
 0x587   : > { %v4021_v26 = vadd.f32 %v4020_v32, %v4019_v8  ;;  %v4022_v47 = vpop.f32.mrb[38].mxu0 }
 0x588   : > { %v4023_v52 = vpop.f32.mrb[39].mxu0 }
 0x589   : > { %v3569_v5 = vadd.f32 %v4021_v26, %v3437_v63 }
 0x58b   : > { %3574 = vst [vmem:[%s339_s29] sm:$0x1] %v3569_v5 }
 0x58c   : > { %4583 = shalt.err (!%p4580_p7)
}
 0x58d   : > { %s4584_s26 = scalar_lea.hbm %s5500_s16, 16  ;;  %s4588_s29 = scalar_lea.hbm %s5551_s9, 32 }
 0x58e   : > { %p4585_p8 = scmp.ne.s32.totalorder %s5500_s16, %s4584_s26  ;;  %p4589_p1 = scmp.lt.u32.totalorder %s5500_s16, %s5551_s9 }
 0x58f   : > { %p4590_p0 = scmp.lt.u32.totalorder %s4588_s29, %s4584_s26  ;;  %p4592_p6 = scmp.lt.u32.totalorder %s4584_s26, %s5500_s16 }
 0x590   : > { %p4586_p11 = pnand %p4585_p8, %p5600_p9 }
 0x591   : > { %p4591_p5 = por %p4590_p0, %p4589_p1 }
 0x592   : > { %p4587_p13 = pneg %p4586_p11 }
 0x593   : > { %p4593_p10 = por %p4592_p6, %p4591_p5 }
 0x595   : > { %p4594_p12 = pnand %p4593_p10, %p4587_p13 }
 0x597   : > { %4597 = shalt.err (!%p4594_p12)
}
 0x598   : > { %4247 = dma.vmem_to_hbm [thread:$0]  (%p5600_p9), %s5502_s23, 16, %s5500_s16, %s3576_s17  }
 0x599 PF: > { %p4259_p2 = scmp.ge.s32.totalorder %s4636_s12, 2  ;;  %s3600_s22 = sand.u32 1, %s4624_s30  }
 0x59a   : > { %p5601_p3 = scmp.ne.s32.totalorder %s5557_s20, 0  ;;  %s3601_s13 = scalar_lea.sflag [#allocation9], %s3600_s22 }
 0x59c   : > { %p4254_p4 = pnand %p4259_p2, %p5601_p3 }
 0x59e   : > { %4619 = dma.done.wait (!%p4254_p4), %s3601_s13, 16  }
 0x59f   : > { %4621 = vsyncadd (!%p4254_p4), %s3601_s13, 4294967280  ;;  %p20_p7 = scmp.ge.s32.totalorder %s4721_s15, 4   ;;  %s5602_s30 = smov %s4628_s10 }
 0x5a0   : > { %s5603_s10 = smov %s4632_s11  ;;  %s5604_s11 = smov %s4732_s18 }
 0x5a1   : > { %s5605_s12 = smov %s4721_s15  ;;  %22 = sbr.rel (!%p20_p7) target bundleno = 4 (0x4), region = 135 }
 0x5a8   :  { %3605 = vsyncpa [#allocation8], 1 }
 0x5a9   :  { %3607 = vsyncpa [#allocation8 + $0x1], 1 }
 0x5aa   :  { %3608 = vsyncpa [#allocation9], 1 }
 0x5ab   :  { %3610 = vsyncpa [#allocation9 + $0x1], 1 }

</bundles_post_ra>
